<compile_context>
chip_gen: v7x
topology: tpu7x:2x2x1
jax: 0.10.0
libtpu: 0.0.40
codegen_flags: <defaults>
</compile_context>

<pallas_src>
import functools

import jax
import jax.numpy as jnp
from jax.experimental import pallas as pl
from jax.experimental.pallas import tpu as pltpu


# ----------------------------------------------------------------------------
# small static helpers
# ----------------------------------------------------------------------------
def _round_up(x, m):
    return ((x + m - 1) // m) * m


def _pick_tile(d, cap):
    """d is a multiple of 128; largest multiple of 128 <= cap that divides d."""
    t = min(cap, d)
    t -= t % 128
    while d % t != 0:
        t -= 128
    return t


def _plan_dim(d, align_small, cap, full_cap=1024):
    """Return (padded_size, tile) for one matmul dimension.

    Avoids padding whenever possible: aligned dims get a <=cap tile, small /
    unaligned dims use a single full-extent tile (block dim == array dim is
    always legal), and only large unaligned dims get padded to 128.
    """
    if d % 128 == 0:
        return d, _pick_tile(d, cap)
    dp = d if d % align_small == 0 else _round_up(d, align_small)
    if dp <= full_cap:
        return dp, dp
    dp = _round_up(d, 128)
    return dp, _pick_tile(dp, cap)


def _apply_act(y, act):
    if act == "relu":
        return jnp.maximum(y, 0.0)
    if act == "leaky_relu":
        return jnp.where(y >= 0, y, 0.01 * y)        # F.leaky_relu default slope
    if act == "sigmoid":
        return 1.0 / (1.0 + jnp.exp(-y))
    if act == "tanh":
        return jnp.tanh(y)
    return y


# ----------------------------------------------------------------------------
# Pallas kernels
# ----------------------------------------------------------------------------
def _mm_kernel(a_ref, b_ref, scale_ref, bias_ref, out_ref, *, act):
    """Tiled matmul; accumulates into the k-resident f32 output block and applies
    a fused per-channel affine (bias / BN scale) + activation epilogue."""
    k = pl.program_id(2)

    @pl.when(k == 0)
    def _():
        out_ref[...] = jnp.zeros_like(out_ref)

    out_ref[...] += jnp.dot(a_ref[...], b_ref[...],
                            preferred_element_type=jnp.float32)

    @pl.when(k == pl.num_programs(2) - 1)
    def _():
        y = out_ref[...] * scale_ref[...] + bias_ref[...]
        out_ref[...] = _apply_act(y, act)


def _affine_act_kernel(x_ref, s_ref, b_ref, o_ref, *, act):
    y = x_ref[...].astype(jnp.float32) * s_ref[...] + b_ref[...]
    o_ref[...] = _apply_act(y, act).astype(o_ref.dtype)


def _sa_kernel(f_ref, g_ref, h_ref, o_ref):
    """Per-(batch, query-block) attention: logits + softmax + attn@v in VMEM."""
    f = f_ref[0]                                   # (TQ, C8)  bf16
    g = g_ref[0]                                   # (L,  C8)  bf16
    h = h_ref[0]                                   # (L,  C )  bf16
    logits = jax.lax.dot_general(f, g, (((1,), (1,)), ((), ())),
                                 preferred_element_type=jnp.float32)
    m = jnp.max(logits, axis=-1, keepdims=True)
    e = jnp.exp(logits - m)
    inv = pl.reciprocal(jnp.sum(e, axis=-1, keepdims=True), approx=True)
    p = (e * inv).astype(h.dtype)
    o_ref[0] = jnp.dot(p, h, preferred_element_type=jnp.float32)


# ----------------------------------------------------------------------------
# Pallas wrappers
# ----------------------------------------------------------------------------
@functools.partial(jax.jit, static_argnames=("act",))
def pallas_matmul(a, b, scale=None, offset=None, act="none"):
    """(M,K)@(K,N) -> f32 (M,N) with fused y = act(y*scale + offset) epilogue.

    bf16 MXU operands, f32 accumulation.  Tiny GEMMs (M<8 or N<8: SE block,
    gen_last conv, final 1x1->3 conv) are routed to plain XLA dot.
    """
    M, K = a.shape
    K2, N = b.shape
    assert K == K2
    if scale is None:
        scale = jnp.ones((N,), jnp.float32)
    if offset is None:
        offset = jnp.zeros((N,), jnp.float32)

    if M < 8 or N < 8:
        y = jnp.dot(a.astype(jnp.bfloat16), b.astype(jnp.bfloat16),
                    preferred_element_type=jnp.float32)
        return _apply_act(y * scale[None, :] + offset[None, :], act)

    a = a.astype(jnp.bfloat16)
    b = b.astype(jnp.bfloat16)

    Mp, TM = _plan_dim(M, 16, cap=1024)
    Kp, TK = _plan_dim(K, 1, cap=512)
    Np, TN = _plan_dim(N, 1, cap=512)

    if (Mp, Kp) != (M, K):
        a = jnp.pad(a, ((0, Mp - M), (0, Kp - K)))
    if (Kp, Np) != (K, N):
        b = jnp.pad(b, ((0, Kp - K), (0, Np - N)))
    if Np != N:
        scale = jnp.pad(scale, (0, Np - N))
        offset = jnp.pad(offset, (0, Np - N))
    s = scale.astype(jnp.float32).reshape(1, Np)
    o = offset.astype(jnp.float32).reshape(1, Np)

    kern = functools.partial(_mm_kernel, act=act)
    out = pl.pallas_call(
        kern,
        out_shape=jax.ShapeDtypeStruct((Mp, Np), jnp.float32),
        grid_spec=pltpu.PrefetchScalarGridSpec(
            num_scalar_prefetch=0,
            grid=(Mp // TM, Np // TN, Kp // TK),
            in_specs=[pl.BlockSpec((TM, TK), lambda i, j, k: (i, k)),
                      pl.BlockSpec((TK, TN), lambda i, j, k: (k, j)),
                      pl.BlockSpec((1, TN), lambda i, j, k: (0, j)),
                      pl.BlockSpec((1, TN), lambda i, j, k: (0, j))],
            out_specs=pl.BlockSpec((TM, TN), lambda i, j, k: (i, j))),
        compiler_params=pltpu.CompilerParams(
            dimension_semantics=("parallel", "parallel", "arbitrary")),
    )(a, b, s, o)
    if (Mp, Np) != (M, N):
        out = out[:M, :N]
    return out


def _fold_factor(R, C):
    """Fold k rows into the channel dim so the last dim is a multiple of 128."""
    k = 1
    while (C * k) % 128 != 0 and R % (2 * k) == 0 and C * k < 4096:
        k *= 2
    if (C * k) % 128 != 0:
        return 1                                   # stay lane-sparse but correct
    return k


def _pick_row_tile(rows, cols):
    cap = max(8, (1 << 19) // max(cols, 1))        # ~2 MB f32 per block
    if rows <= cap:
        return rows
    t = (cap // 8) * 8
    while t > 8 and rows % t != 0:
        t -= 8
    if rows % t != 0:
        t = rows
    return t


@functools.partial(jax.jit, static_argnames=("act", "out_dtype"))
def affine_act(x2d, scale, offset, act, out_dtype=jnp.float32):
    """Fused y = act(x * scale + offset), per-channel.  Lane-dense output blocks
    (rows folded into channels for C < 128)."""
    R, C = x2d.shape
    k = _fold_factor(R, C)
    rows, cols = R // k, C * k
    x = x2d.reshape(rows, cols)
    s = jnp.tile(scale.astype(jnp.float32), k).reshape(1, cols)
    b = jnp.tile(offset.astype(jnp.float32), k).reshape(1, cols)
    tr = _pick_row_tile(rows, cols)
    kern = functools.partial(_affine_act_kernel, act=act)
    y = pl.pallas_call(
        kern,
        out_shape=jax.ShapeDtypeStruct((rows, cols), out_dtype),
        grid_spec=pltpu.PrefetchScalarGridSpec(
            num_scalar_prefetch=0,
            grid=(rows // tr,),
            in_specs=[pl.BlockSpec((tr, cols), lambda i: (i, 0)),
                      pl.BlockSpec((1, cols), lambda i: (0, 0)),
                      pl.BlockSpec((1, cols), lambda i: (0, 0))],
            out_specs=pl.BlockSpec((tr, cols), lambda i: (i, 0))),
        compiler_params=pltpu.CompilerParams(
            dimension_semantics=("parallel",)),
    )(x, s, b)
    return y.reshape(R, C)


@jax.jit
def _sa_attend(f, g, h):
    """Batched softmax(f @ g^T) @ h.  f,g: (N,L,C8) bf16; h: (N,L,C) bf16."""
    N, L, c8 = f.shape
    C = h.shape[-1]
    TQ = min(256, L)
    assert L % TQ == 0
    return pl.pallas_call(
        _sa_kernel,
        out_shape=jax.ShapeDtypeStruct((N, L, C), jnp.float32),
        grid_spec=pltpu.PrefetchScalarGridSpec(
            num_scalar_prefetch=0,
            grid=(N, L // TQ),
            in_specs=[pl.BlockSpec((1, TQ, c8), lambda n, q: (n, q, 0)),
                      pl.BlockSpec((1, L, c8), lambda n, q: (n, 0, 0)),
                      pl.BlockSpec((1, L, C), lambda n, q: (n, 0, 0))],
            out_specs=pl.BlockSpec((1, TQ, C), lambda n, q: (n, q, 0))),
        compiler_params=pltpu.CompilerParams(
            dimension_semantics=("parallel", "parallel")),
    )(f, g, h)


# ----------------------------------------------------------------------------
# Ops built on the kernels (im2col / stats glue is plain JAX, compute is Pallas)
# ----------------------------------------------------------------------------
def conv2d(x, w, bias=None, stride=1, pad=0, act="none"):
    """x: NHWC, w: (kh, kw, cin, cout). Conv as bf16 im2col + fused Pallas matmul."""
    kh, kw, cin, cout = w.shape
    N, H, W, C = x.shape
    assert C == cin
    x = x.astype(jnp.bfloat16)                      # bf16 activation stream to MXU
    if pad:
        x = jnp.pad(x, ((0, 0), (pad, pad), (pad, pad), (0, 0)))
    Hp, Wp = x.shape[1], x.shape[2]
    oh = (Hp - kh) // stride + 1
    ow = (Wp - kw) // stride + 1
    if kh == 1 and kw == 1 and stride == 1:
        cols = x.reshape(N * oh * ow, cin)
    else:
        # TODO(synk): im2col (and the nearest-2x upsample feeding it in the
        # decoder) is still materialized in HBM (in bf16); full fusion into the
        # matmul input DMA would need a halo / Element-indexed BlockSpec gather.
        slices = [x[:, i:i + stride * oh:stride, j:j + stride * ow:stride, :]
                  for i in range(kh) for j in range(kw)]
        cols = jnp.concatenate(slices, axis=-1).reshape(N * oh * ow, kh * kw * cin)
    y = pallas_matmul(cols, w.reshape(kh * kw * cin, cout), offset=bias, act=act)
    return y.reshape(N, oh, ow, cout)


def batchnorm_act(x, gamma, beta, act, eps=1e-5, out_dtype=jnp.float32):
    """BatchNorm2d (train-mode batch statistics, like a fresh nn.BatchNorm2d) + act.
    TODO(synk): no running-mean/var eval-mode path (matches original assumption)."""
    N, H, W, C = x.shape
    x2 = x.reshape(-1, C)
    x32 = x2.astype(jnp.float32)
    cnt = x32.shape[0]
    s1 = jnp.sum(x32, axis=0)                       # single-pass stats (XLA fuses)
    s2 = jnp.sum(x32 * x32, axis=0)
    mean = s1 / cnt
    var = jnp.maximum(s2 / cnt - mean * mean, 0.0)
    scale = gamma * jax.lax.rsqrt(var + eps)
    offset = beta - mean * scale
    return affine_act(x2, scale, offset, act, out_dtype=out_dtype).reshape(N, H, W, C)


def upsample2x(x):
    return jnp.repeat(jnp.repeat(x, 2, axis=1), 2, axis=2)


def avgpool2x(x):
    N, H, W, C = x.shape
    return x.reshape(N, H // 2, 2, W // 2, 2, C).mean(axis=(2, 4))


def adaptive_avgpool_2x2(x):
    N, H, W, C = x.shape
    assert H % 2 == 0 and W % 2 == 0
    return x.reshape(N, 2, H // 2, 2, W // 2, C).mean(axis=(2, 4))


def se_block(x, p):
    # TODO(synk): SEBlock source not provided; standard squeeze-excitation (r=16) assumed.
    N, H, W, C = x.shape
    s = jnp.mean(x, axis=(1, 2))                    # (N, C) squeeze
    z = pallas_matmul(s, p["w1"], offset=p["b1"], act="relu")       # tiny-M -> XLA path
    g = pallas_matmul(z, p["w2"], offset=p["b2"], act="sigmoid")
    return x * g[:, None, None, :].astype(x.dtype)


def self_attention(x, p):
    # TODO(synk): SelfAttention2d source not provided; SAGAN-style attention
    # (f,g = C/8, h = C, learnable gamma initialized to 0 -> identity) assumed.
    N, H, W, C = x.shape
    L = H * W
    xf = x.reshape(N * L, C)
    f = pallas_matmul(xf, p["wf"]).astype(jnp.bfloat16).reshape(N, L, -1)
    g = pallas_matmul(xf, p["wg"]).astype(jnp.bfloat16).reshape(N, L, -1)
    h = pallas_matmul(xf, p["wh"]).astype(jnp.bfloat16).reshape(N, L, C)
    attn = _sa_attend(f, g, h).reshape(N, H, W, C)
    return x + p["gamma"] * attn


# ----------------------------------------------------------------------------
# Blocks (canonical structures assumed where source is unavailable)
# ----------------------------------------------------------------------------
def block_upsample(x, p, act="relu"):
    # TODO(synk): BlockUpsample2d source not provided; pre-activation
    # BN -> act -> nearest-upsample(x2) -> conv3x3 -> (SE) assumed. dropout=0 -> no-op.
    h = batchnorm_act(x, p["gamma"], p["beta"], act, out_dtype=jnp.bfloat16)
    h = upsample2x(h)
    h = conv2d(h, p["w"], pad=1)
    if "se" in p:
        h = se_block(h, p["se"])
    return h


def first_block_down(x, p, act="leaky_relu"):
    # TODO(synk): FirstBlockDown2d source not provided; conv3x3 -> BN -> act -> avgpool2 assumed.
    h = conv2d(x, p["w"], pad=1)
    h = batchnorm_act(h, p["gamma"], p["beta"], act)
    return avgpool2x(h)


def inverted_res(x, p, act="leaky_relu", downscale=True):
    # TODO(synk): InvertedRes2d source not provided; MobileNetV2-style
    # expand(1x1) -> 3x3(stride-2 when downscale) -> project(1x1) with 1x1-conv shortcut assumed.
    h = conv2d(x, p["w1"])
    h = batchnorm_act(h, p["bn1"]["gamma"], p["bn1"]["beta"], act, out_dtype=jnp.bfloat16)
    h = conv2d(h, p["w2"], stride=2 if downscale else 1, pad=1)
    h = batchnorm_act(h, p["bn2"]["gamma"], p["bn2"]["beta"], act, out_dtype=jnp.bfloat16)
    h = conv2d(h, p["w3"])
    h = batchnorm_act(h, p["bn3"]["gamma"], p["bn3"]["beta"], "none")
    sc = avgpool2x(x) if downscale else x
    sc = conv2d(sc, p["wsc"])
    out = h + sc
    if "se" in p:
        out = se_block(out, p["se"])
    return out


# ----------------------------------------------------------------------------
# Full model forward
# ----------------------------------------------------------------------------
def imgfeat2img(latent, P):
    x = latent.reshape(-1, 1, 1, 4096)              # NHWC view of (B, 4096, 1, 1)
    x = block_upsample(x, P["up1"])
    x = block_upsample(x, P["up2"])
    x = block_upsample(x, P["up3"])
    x = block_upsample(x, P["up4"])
    x = block_upsample(x, P["up5"])                 # seblock=True
    x = self_attention(x, P["sa"])
    x = block_upsample(x, P["up6"])
    x = block_upsample(x, P["up7"])
    x = block_upsample(x, P["up8"])
    x = batchnorm_act(x, P["last_bn"]["gamma"], P["last_bn"]["beta"], "relu",
                      out_dtype=jnp.bfloat16)
    x = conv2d(x, P["last_w"], bias=P["last_b"], act="tanh")   # 1x1 conv + bias + tanh fused
    return x


def generator_forward(x_nchw, P):
    x = jnp.transpose(x_nchw, (0, 2, 3, 1))         # NCHW -> NHWC
    dn = first_block_down(x, P["dn1"])
    dn = inverted_res(dn, P["dn2"])
    dn3 = inverted_res(dn, P["dn3"])
    dn4 = inverted_res(dn3, P["dn4"])
    dn4 = self_attention(dn4, P["sa_dn"])
    dn5 = inverted_res(dn4, P["dn5"])               # seblock=True
    dn6 = inverted_res(dn5, P["dn6"])
    h = batchnorm_act(dn6, P["gen_last_bn"]["gamma"], P["gen_last_bn"]["beta"], "relu")
    h = adaptive_avgpool_2x2(h)
    lat = conv2d(h, P["gen_last_w"], bias=P["gen_last_b"], act="none")  # k=2 conv + bias
    latent = lat.reshape(-1, 4096)
    img = imgfeat2img(latent, P["img"])
    return jnp.transpose(img, (0, 3, 1, 2)), latent  # back to NCHW


# ----------------------------------------------------------------------------
# Deterministic parameter init
# ----------------------------------------------------------------------------
def init_params(key):
    keys = iter(jax.random.split(key, 128))

    def nk():
        return next(keys)

    def conv_w(kh, kw, cin, cout):
        std = (2.0 / (kh * kw * cin)) ** 0.5
        return jax.random.normal(nk(), (kh, kw, cin, cout), jnp.float32) * std

    def bn(c):
        return {"gamma": jnp.ones((c,), jnp.float32),
                "beta": jnp.zeros((c,), jnp.float32)}

    def se(c, r=16):
        cr = max(c // r, 1)
        return {"w1": conv_w(1, 1, c, cr).reshape(c, cr),
                "b1": jnp.zeros((cr,), jnp.float32),
                "w2": conv_w(1, 1, cr, c).reshape(cr, c),
                "b2": jnp.zeros((c,), jnp.float32)}

    def sa(c):
        # gamma initialized to 0 (canonical SAGAN identity init); the attention
        # path is still computed so the kernels are exercised.
        return {"wf": conv_w(1, 1, c, c // 8).reshape(c, c // 8),
                "wg": conv_w(1, 1, c, c // 8).reshape(c, c // 8),
                "wh": conv_w(1, 1, c, c).reshape(c, c),
                "gamma": jnp.float32(0.0)}

    def up_block(cin, cout, seblock=False):
        p = {"w": conv_w(3, 3, cin, cout), **bn(cin)}
        if seblock:
            p["se"] = se(cout)
        return p

    def inv_res(cin, planes, cout, seblock=False):
        p = {"w1": conv_w(1, 1, cin, planes), "bn1": bn(planes),
             "w2": conv_w(3, 3, planes, planes), "bn2": bn(planes),
             "w3": conv_w(1, 1, planes, cout), "bn3": bn(cout),
             "wsc": conv_w(1, 1, cin, cout)}
        if seblock:
            p["se"] = se(cout)
        return p

    return {
        "dn1": {"w": conv_w(3, 3, 2, 16), **bn(16)},
        "dn2": inv_res(16, 32, 32),
        "dn3": inv_res(32, 64, 64),
        "dn4": inv_res(64, 128, 128),
        "sa_dn": sa(128),
        "dn5": inv_res(128, 256, 256, seblock=True),
        "dn6": inv_res(256, 512, 512),
        "gen_last_bn": bn(512),
        "gen_last_w": conv_w(2, 2, 512, 4096),
        "gen_last_b": jnp.zeros((4096,), jnp.float32),
        "img": {
            "up1": up_block(4096, 512),
            "up2": up_block(512, 256),
            "up3": up_block(256, 128),
            "up4": up_block(128, 64),
            "up5": up_block(64, 64, seblock=True),
            "sa": sa(64),
            "up6": up_block(64, 32),
            "up7": up_block(32, 32),
            "up8": up_block(32, 16),
            "last_bn": bn(16),
            "last_w": conv_w(1, 1, 16, 3),
            "last_b": jnp.zeros((3,), jnp.float32),
        },
    }


if __name__ == "__main__":
    key = jax.random.PRNGKey(0)
    pkey, xkey = jax.random.split(key)
    params = init_params(pkey)

    # 2-channel spectrogram-like input, NCHW; 128x128 so the 6 downsample stages
    # reach the 2x2 map expected by the 2x2 latent conv.
    x = jax.random.normal(xkey, (2, 2, 128, 128), jnp.float32)

    img, latent = generator_forward(x, params)
    jax.block_until_ready((img, latent))

    assert img.shape == (2, 3, 256, 256), img.shape
    assert latent.shape == (2, 4096), latent.shape
    assert img.dtype == jnp.float32 and latent.dtype == jnp.float32
    assert bool(jnp.all(jnp.isfinite(img))) and bool(jnp.all(jnp.isfinite(latent)))
    print("KERNEL_OK")
</pallas_src>

<mosaic_0001>
module attributes {stable_mosaic.version = 11 : i64} {
  func.func @_mm_kernel(%arg0: i32, %arg1: i32, %arg2: i32, %arg3: memref<1024x18xbf16, #tpu.memory_space<vmem>>, %arg4: memref<18x16xbf16, #tpu.memory_space<vmem>>, %arg5: memref<1x16xf32, #tpu.memory_space<vmem>>, %arg6: memref<1x16xf32, #tpu.memory_space<vmem>>, %arg7: memref<1024x16xf32, #tpu.memory_space<vmem>>) attributes {dimension_semantics = [#tpu.dimension_semantics<parallel>, #tpu.dimension_semantics<parallel>, #tpu.dimension_semantics<arbitrary>], iteration_bounds = array<i64: 32, 1, 1>, scalar_prefetch = 0 : i64, scratch_operands = 0 : i64, tpu.core_type = #tpu.core_type<tc>, window_params = [{transform_indices = @transform_0, window_bounds = array<i64: 1024, 18>}, {transform_indices = @transform_1, window_bounds = array<i64: 18, 16>}, {transform_indices = @transform_2, window_bounds = array<i64: 1, 16>}, {transform_indices = @transform_3, window_bounds = array<i64: 1, 16>}, {transform_indices = @transform_4, window_bounds = array<i64: 1024, 16>}]} {
    %c0_i32 = arith.constant 0 : i32
    %0 = arith.cmpi eq, %arg2, %c0_i32 : i32
    %1 = arith.extui %0 : i1 to i32
    %c0_i32_0 = arith.constant 0 : i32
    %2 = arith.cmpi ne, %1, %c0_i32_0 : i32
    scf.if %2 {
      %cst_10 = arith.constant 0.000000e+00 : f32
      %12 = vector.broadcast %cst_10 : f32 to vector<1024x16xf32>
      %c0_11 = arith.constant 0 : index
      %c0_12 = arith.constant 0 : index
      %13 = vector.load %arg7[%c0_11, %c0_12] : memref<1024x16xf32, #tpu.memory_space<vmem>>, vector<1024x16xf32>
      tpu.vector_store %arg7[%c0_11, %c0_12], %12 {strides = array<i32>} : memref<1024x16xf32, #tpu.memory_space<vmem>>, vector<1024x16xf32>,
    } else {
    }
    %c0 = arith.constant 0 : index
    %c0_1 = arith.constant 0 : index
    %3 = vector.load %arg7[%c0, %c0_1] : memref<1024x16xf32, #tpu.memory_space<vmem>>, vector<1024x16xf32>
    %c0_2 = arith.constant 0 : index
    %c0_3 = arith.constant 0 : index
    %4 = vector.load %arg3[%c0_2, %c0_3] : memref<1024x18xbf16, #tpu.memory_space<vmem>>, vector<1024x18xbf16>
    %c0_4 = arith.constant 0 : index
    %c0_5 = arith.constant 0 : index
    %5 = vector.load %arg4[%c0_4, %c0_5] : memref<18x16xbf16, #tpu.memory_space<vmem>>, vector<18x16xbf16>
    %cst = arith.constant dense<0.000000e+00> : vector<1024x16xf32>
    %6 = tpu.matmul %4, %5, %cst {dimension_numbers = #tpu.dot_dimension_numbers<[1], [0], [0], [1], [0, 0, 1, 1], [], []>} : vector<1024x18xbf16>, vector<18x16xbf16>, vector<1024x16xf32> -> vector<1024x16xf32>
    %7 = arith.addf %3, %6 : vector<1024x16xf32>
    %c0_6 = arith.constant 0 : index
    %c0_7 = arith.constant 0 : index
    %8 = vector.load %arg7[%c0_6, %c0_7] : memref<1024x16xf32, #tpu.memory_space<vmem>>, vector<1024x16xf32>
    tpu.vector_store %arg7[%c0_6, %c0_7], %7 {strides = array<i32>} : memref<1024x16xf32, #tpu.memory_space<vmem>>, vector<1024x16xf32>,
    %c0_i32_8 = arith.constant 0 : i32
    %9 = arith.cmpi eq, %arg2, %c0_i32_8 : i32
    %10 = arith.extui %9 : i1 to i32
    %c0_i32_9 = arith.constant 0 : i32
    %11 = arith.cmpi ne, %10, %c0_i32_9 : i32
    scf.if %11 {
      %c0_10 = arith.constant 0 : index
      %c0_11 = arith.constant 0 : index
      %12 = vector.load %arg7[%c0_10, %c0_11] : memref<1024x16xf32, #tpu.memory_space<vmem>>, vector<1024x16xf32>
      %c0_12 = arith.constant 0 : index
      %c0_13 = arith.constant 0 : index
      %13 = vector.load %arg5[%c0_12, %c0_13] : memref<1x16xf32, #tpu.memory_space<vmem>>, vector<1x16xf32>
      %14 = vector.broadcast %13 : vector<1x16xf32> to vector<1024x16xf32>
      %15 = arith.mulf %12, %14 : vector<1024x16xf32>
      %c0_14 = arith.constant 0 : index
      %c0_15 = arith.constant 0 : index
      %16 = vector.load %arg6[%c0_14, %c0_15] : memref<1x16xf32, #tpu.memory_space<vmem>>, vector<1x16xf32>
      %17 = vector.broadcast %16 : vector<1x16xf32> to vector<1024x16xf32>
      %18 = arith.addf %15, %17 : vector<1024x16xf32>
      %c0_16 = arith.constant 0 : index
      %c0_17 = arith.constant 0 : index
      %19 = vector.load %arg7[%c0_16, %c0_17] : memref<1024x16xf32, #tpu.memory_space<vmem>>, vector<1024x16xf32>
      tpu.vector_store %arg7[%c0_16, %c0_17], %18 {strides = array<i32>} : memref<1024x16xf32, #tpu.memory_space<vmem>>, vector<1024x16xf32>,
    } else {
    }
    return
  }
  func.func @transform_0(%arg0: i32, %arg1: i32, %arg2: i32) -> (i32, i32) {
    %c0_i32 = arith.constant 0 : i32
    return %arg0, %arg2 : i32, i32
  }
  func.func @transform_1(%arg0: i32, %arg1: i32, %arg2: i32) -> (i32, i32) {
    %c0_i32 = arith.constant 0 : i32
    return %arg2, %arg1 : i32, i32
  }
  func.func @transform_2(%arg0: i32, %arg1: i32, %arg2: i32) -> (i32, i32) {
    %c0_i32 = arith.constant 0 : i32
    %c0_i32_0 = arith.constant 0 : i32
    return %c0_i32, %arg1 : i32, i32
  }
  func.func @transform_3(%arg0: i32, %arg1: i32, %arg2: i32) -> (i32, i32) {
    %c0_i32 = arith.constant 0 : i32
    %c0_i32_0 = arith.constant 0 : i32
    return %c0_i32, %arg1 : i32, i32
  }
  func.func @transform_4(%arg0: i32, %arg1: i32, %arg2: i32) -> (i32, i32) {
    %c0_i32 = arith.constant 0 : i32
    return %arg0, %arg1 : i32, i32
  }
}

</mosaic_0001>

<bundles_post_ra>
// kernel: pallas_matmul.1
= control target key start
LH: loop header
LB: loop body
LE: loop exit
PB: predicated region body
PF: predicated region fallthrough
CT: control target
= control target key end

     0   :  { %s3166_s15 = smov 0   ;;  %s3168_s16 = smov 0   ;;  %s4768_s0 = inlined_call_operand.vmem [shape: bf16[32768,18], index: 0, kind: input, shape index: {}]   ;;  %s4769_s1 = inlined_call_operand.vmem [shape: bf16[18,16], index: 1, kind: input, shape index: {}]   ;;  %s4770_s2 = inlined_call_operand.vmem [shape: f32[1,16], index: 2, kind: input, shape index: {}]   ;;  %s4771_s3 = inlined_call_operand.vmem [shape: f32[1,16], index: 3, kind: input, shape index: {}]   ;;  %s4772_s4 = inlined_call_operand.vmem [shape: f32[32768,16], index: 4, kind: output, shape index: {}]  }
   0x1   :  { %s3170_s17 = smov 0  }
   0x2 LB: > { %s33_s18 = sadd.s32 1, %s3134_s16  ;;  %p2680_p0 = scmp.ge.s32.totalorder %s3138_s17, 1  ;;  %s3138_s17 = sphi %s3170_s17, %s14_s17   ;;  %s3134_s16 = sphi %s3168_s16, %s4774_s16   ;;  %s3130_s15 = sphi %s3166_s15, %s4773_s15  }
   0x3   : > { %p35_p1 = scmp.ge.s32.totalorder %s33_s18, 32  ;;  %p221_p2 = scmp.lt.s32.totalorder %s3138_s17, 33 }
   0x5   : > { %s4776_s18 = smov (%p35_p1, %s33_s18), 0  ;;  %p222_p3 = pnand %p2680_p0, %p221_p2 }
   0x6   : > { %v3048_v0 = vld [vmem:[%s4769_s1] sm:$0xff] (!%p222_p3)   ;;  %vm1215_vm0 = vcmask (!%p222_p3), 1040384   ;;  %v3049_v1 = vld [vmem:[%s4769_s1 + $0x8] ss:$0 sps:$4 sm:$0x11] (!%p222_p3)   ;;  %s2681_s23 = sshll.u32 (!%p222_p3), %s3130_s15, 7 }
   0x7   : > { %225 = sbr.rel (%p222_p3) target bundleno = 375 (0x177), region = 36  ;;  %2885 = vmatprep.subr.bf16.mxu0 (!%p222_p3), %v3048_v0  ;;  %3017 = vmatprep.subr.bf16.mxu1 (!%p222_p3), %v3048_v0  ;;  %p268_p4 = scmp.lt.s32.totalorder (!%p222_p3), %s2681_s23, 4095  ;;  %v1217_v2 = vsel (!%p222_p3), %vm1215_vm0, %v3049_v1, 0  ;;  %vm305_vm1 = vcmask (!%p222_p3), 130048   ;;  %vm1022_vm2 = vcmask (!%p222_p3), 146432   ;;  %v3140_v4 = vmov (!%p222_p3), 0.0  }
   0x8   : > { %2886 = vmatpush3.bf16.msra.mxu0 (!%p222_p3), %v3048_v0  ;;  %3019 = vmatpush3.bf16.msra.mxu1 (!%p222_p3), %v3048_v0 }
   0x9   : > { %3021 = vmatprep.subr.msk.bf16.mxu0 (!%p222_p3), %vm1215_vm0, %v3049_v1  ;;  %3022 = vmatprep.subr.msk.bf16.mxu1 (!%p222_p3), %vm1215_vm0, %v3049_v1 }
   0xc   : > { %2888 = vmatpush3.bf16.msra.mxu0 (!%p222_p3), %v1217_v2  ;;  %3020 = vmatpush3.bf16.msra.mxu1 (!%p222_p3), %v1217_v2 }
   0xe   : > { %s4778_s23 = smov (!%p268_p4, %s2681_s23), 4095 }
   0xf   : > { %s2682_s24 = sshll.u32 %s4778_s23, 2  ;;  %s2684_s25 = sshll.u32 %s4778_s23, 3 }
  0x10   : > { %s3193_s28 = scalar_lea.vmem %s4768_s0, %s2682_s24  ;;  %s3198_s5 = scalar_lea.vmem %s4772_s4, %s2684_s25 }
  0x11   : > { %v3201_v3 = vld [vmem:[%s3193_s28] sm:$0xff]   ;;  %308 = vst.msk [vmem:[%s3198_s5 + $0x10] sm:$0xff] %vm305_vm1, %v3140_v4  ;;  %306 = vst.msk [vmem:[%s3198_s5] sm:$0xff] %vm305_vm1, %v3140_v4  ;;  %v3052_v6 = vld [vmem:[%s3193_s28 + $0x8] sm:$0xff]  }
  0x12   : > { %307 = vst.msk [vmem:[%s3198_s5 + $0x8] sm:$0xff] %vm305_vm1, %v3140_v4  ;;  %309 = vst.msk [vmem:[%s3198_s5 + $0x18] sm:$0xff] %vm305_vm1, %v3140_v4  ;;  %v3051_v5 = vld [vmem:[%s3193_s28 + $0x100] sm:$0xff]   ;;  %2889 = vmatprep.mubr.msk.bf16.mxu0 %vm1022_vm2, %v3201_v3  ;;  %v3053_v7 = vld [vmem:[%s3193_s28 + $0x108] sm:$0xff]  }
  0x13   : > { %310 = vst.msk [vmem:[%s3198_s5 + $0x20] sm:$0xff] %vm305_vm1, %v3140_v4  ;;  %311 = vst.msk [vmem:[%s3198_s5 + $0x28] sm:$0xff] %vm305_vm1, %v3140_v4  ;;  %2953 = vmatprep.mubr.msk.bf16.mxu1 %vm1022_vm2, %v3051_v5  ;;  %2890 = vmatmul.mubr.msk.bf16.vlgmr.msra.gmra.mrb[0].mxu0 %vm1022_vm2, %v3052_v6  ;;  %v3054_v8 = vld [vmem:[%s3193_s28 + $0x10] sm:$0xff]   ;;  %v3056_v10 = vld [vmem:[%s3193_s28 + $0x18] sm:$0xff]  }
  0x14   : > { %312 = vst.msk [vmem:[%s3198_s5 + $0x30] sm:$0xff] %vm305_vm1, %v3140_v4  ;;  %313 = vst.msk [vmem:[%s3198_s5 + $0x38] sm:$0xff] %vm305_vm1, %v3140_v4  ;;  %2954 = vmatmul.mubr.msk.bf16.vlgmr.msra.gmra.mrb[0].mxu1 %vm1022_vm2, %v3053_v7  ;;  %v3055_v9 = vld [vmem:[%s3193_s28 + $0x110] sm:$0xff]   ;;  %2893 = vmatprep.mubr.msk.bf16.mxu0 %vm1022_vm2, %v3054_v8  ;;  %v3057_v11 = vld [vmem:[%s3193_s28 + $0x118] sm:$0xff]  }
  0x15   : > { %314 = vst.msk [vmem:[%s3198_s5 + $0x40] sm:$0xff] %vm305_vm1, %v3140_v4  ;;  %315 = vst.msk [vmem:[%s3198_s5 + $0x48] sm:$0xff] %vm305_vm1, %v3140_v4  ;;  %2957 = vmatprep.mubr.msk.bf16.mxu1 %vm1022_vm2, %v3055_v9  ;;  %v3058_v12 = vld [vmem:[%s3193_s28 + $0x20] sm:$0xff]   ;;  %v3060_v14 = vld [vmem:[%s3193_s28 + $0x28] sm:$0xff]  }
  0x16   : > { %316 = vst.msk [vmem:[%s3198_s5 + $0x50] sm:$0xff] %vm305_vm1, %v3140_v4  ;;  %317 = vst.msk [vmem:[%s3198_s5 + $0x58] sm:$0xff] %vm305_vm1, %v3140_v4  ;;  %v3059_v13 = vld [vmem:[%s3193_s28 + $0x120] sm:$0xff]   ;;  %v3061_v15 = vld [vmem:[%s3193_s28 + $0x128] sm:$0xff]  }
  0x17   : > { %318 = vst.msk [vmem:[%s3198_s5 + $0x60] sm:$0xff] %vm305_vm1, %v3140_v4  ;;  %319 = vst.msk [vmem:[%s3198_s5 + $0x68] sm:$0xff] %vm305_vm1, %v3140_v4  ;;  %v3062_v16 = vld [vmem:[%s3193_s28 + $0x30] sm:$0xff]   ;;  %v3064_v18 = vld [vmem:[%s3193_s28 + $0x38] sm:$0xff]  }
  0x18   : > { %320 = vst.msk [vmem:[%s3198_s5 + $0x70] sm:$0xff] %vm305_vm1, %v3140_v4  ;;  %321 = vst.msk [vmem:[%s3198_s5 + $0x78] sm:$0xff] %vm305_vm1, %v3140_v4  ;;  %v3063_v17 = vld [vmem:[%s3193_s28 + $0x130] sm:$0xff]   ;;  %v3065_v19 = vld [vmem:[%s3193_s28 + $0x138] sm:$0xff]  }
  0x19   : > { %322 = vst.msk [vmem:[%s3198_s5 + $0x80] sm:$0xff] %vm305_vm1, %v3140_v4  ;;  %323 = vst.msk [vmem:[%s3198_s5 + $0x88] sm:$0xff] %vm305_vm1, %v3140_v4  ;;  %v3066_v20 = vld [vmem:[%s3193_s28 + $0x40] sm:$0xff]   ;;  %v3068_v22 = vld [vmem:[%s3193_s28 + $0x48] sm:$0xff]  }
  0x1a   : > { %324 = vst.msk [vmem:[%s3198_s5 + $0x90] sm:$0xff] %vm305_vm1, %v3140_v4  ;;  %325 = vst.msk [vmem:[%s3198_s5 + $0x98] sm:$0xff] %vm305_vm1, %v3140_v4  ;;  %v3067_v21 = vld [vmem:[%s3193_s28 + $0x140] sm:$0xff]   ;;  %v3069_v23 = vld [vmem:[%s3193_s28 + $0x148] sm:$0xff]  }
  0x1b   : > { %326 = vst.msk [vmem:[%s3198_s5 + $0xa0] sm:$0xff] %vm305_vm1, %v3140_v4  ;;  %327 = vst.msk [vmem:[%s3198_s5 + $0xa8] sm:$0xff] %vm305_vm1, %v3140_v4  ;;  %2894 = vmatmul.mubr.msk.bf16.gmra.mrb[4].mxu0 %vm1022_vm2, %v3056_v10  ;;  %v3070_v24 = vld [vmem:[%s3193_s28 + $0x50] sm:$0xff]   ;;  %v3072_v26 = vld [vmem:[%s3193_s28 + $0x58] sm:$0xff]  }
  0x1c   : > { %328 = vst.msk [vmem:[%s3198_s5 + $0xb0] sm:$0xff] %vm305_vm1, %v3140_v4  ;;  %329 = vst.msk [vmem:[%s3198_s5 + $0xb8] sm:$0xff] %vm305_vm1, %v3140_v4  ;;  %2958 = vmatmul.mubr.msk.bf16.gmra.mrb[4].mxu1 %vm1022_vm2, %v3057_v11  ;;  %2897 = vmatprep.mubr.msk.bf16.mxu0 %vm1022_vm2, %v3058_v12  ;;  %v3071_v25 = vld [vmem:[%s3193_s28 + $0x150] sm:$0xff]   ;;  %v3073_v27 = vld [vmem:[%s3193_s28 + $0x158] sm:$0xff]  }
  0x1d   : > { %330 = vst.msk [vmem:[%s3198_s5 + $0xc0] sm:$0xff] %vm305_vm1, %v3140_v4  ;;  %331 = vst.msk [vmem:[%s3198_s5 + $0xc8] sm:$0xff] %vm305_vm1, %v3140_v4  ;;  %2961 = vmatprep.mubr.msk.bf16.mxu1 %vm1022_vm2, %v3059_v13  ;;  %v3074_v28 = vld [vmem:[%s3193_s28 + $0x60] sm:$0xff]   ;;  %v3076_v30 = vld [vmem:[%s3193_s28 + $0x68] sm:$0xff]  }
  0x1e   : > { %332 = vst.msk [vmem:[%s3198_s5 + $0xd0] sm:$0xff] %vm305_vm1, %v3140_v4  ;;  %333 = vst.msk [vmem:[%s3198_s5 + $0xd8] sm:$0xff] %vm305_vm1, %v3140_v4  ;;  %v3075_v29 = vld [vmem:[%s3193_s28 + $0x160] sm:$0xff]   ;;  %v3077_v31 = vld [vmem:[%s3193_s28 + $0x168] sm:$0xff]  }
  0x1f   : > { %334 = vst.msk [vmem:[%s3198_s5 + $0xe0] sm:$0xff] %vm305_vm1, %v3140_v4  ;;  %335 = vst.msk [vmem:[%s3198_s5 + $0xe8] sm:$0xff] %vm305_vm1, %v3140_v4  ;;  %v3078_v32 = vld [vmem:[%s3193_s28 + $0x70] sm:$0xff]   ;;  %v3080_v34 = vld [vmem:[%s3193_s28 + $0x78] sm:$0xff]  }
  0x20   : > { %336 = vst.msk [vmem:[%s3198_s5 + $0xf0] sm:$0xff] %vm305_vm1, %v3140_v4  ;;  %337 = vst.msk [vmem:[%s3198_s5 + $0xf8] sm:$0xff] %vm305_vm1, %v3140_v4  ;;  %v3079_v33 = vld [vmem:[%s3193_s28 + $0x170] sm:$0xff]   ;;  %v3081_v35 = vld [vmem:[%s3193_s28 + $0x178] sm:$0xff]  }
  0x21   : > { %338 = vst.msk [vmem:[%s3198_s5 + $0x100] sm:$0xff] %vm305_vm1, %v3140_v4  ;;  %339 = vst.msk [vmem:[%s3198_s5 + $0x108] sm:$0xff] %vm305_vm1, %v3140_v4  ;;  %v3082_v36 = vld [vmem:[%s3193_s28 + $0x80] sm:$0xff]   ;;  %v3084_v38 = vld [vmem:[%s3193_s28 + $0x88] sm:$0xff]  }
  0x22   : > { %340 = vst.msk [vmem:[%s3198_s5 + $0x110] sm:$0xff] %vm305_vm1, %v3140_v4  ;;  %341 = vst.msk [vmem:[%s3198_s5 + $0x118] sm:$0xff] %vm305_vm1, %v3140_v4  ;;  %v3083_v37 = vld [vmem:[%s3193_s28 + $0x180] sm:$0xff]   ;;  %v3085_v39 = vld [vmem:[%s3193_s28 + $0x188] sm:$0xff]  }
  0x23   : > { %342 = vst.msk [vmem:[%s3198_s5 + $0x120] sm:$0xff] %vm305_vm1, %v3140_v4  ;;  %343 = vst.msk [vmem:[%s3198_s5 + $0x128] sm:$0xff] %vm305_vm1, %v3140_v4  ;;  %2898 = vmatmul.mubr.msk.bf16.gmra.mrb[8].mxu0 %vm1022_vm2, %v3060_v14  ;;  %v3086_v40 = vld [vmem:[%s3193_s28 + $0x90] sm:$0xff]   ;;  %v3088_v42 = vld [vmem:[%s3193_s28 + $0x98] sm:$0xff]  }
  0x24   : > { %344 = vst.msk [vmem:[%s3198_s5 + $0x130] sm:$0xff] %vm305_vm1, %v3140_v4  ;;  %345 = vst.msk [vmem:[%s3198_s5 + $0x138] sm:$0xff] %vm305_vm1, %v3140_v4  ;;  %2962 = vmatmul.mubr.msk.bf16.gmra.mrb[8].mxu1 %vm1022_vm2, %v3061_v15  ;;  %2901 = vmatprep.mubr.msk.bf16.mxu0 %vm1022_vm2, %v3062_v16  ;;  %v3087_v41 = vld [vmem:[%s3193_s28 + $0x190] sm:$0xff]   ;;  %v3089_v43 = vld [vmem:[%s3193_s28 + $0x198] sm:$0xff]  }
  0x25   : > { %346 = vst.msk [vmem:[%s3198_s5 + $0x140] sm:$0xff] %vm305_vm1, %v3140_v4  ;;  %347 = vst.msk [vmem:[%s3198_s5 + $0x148] sm:$0xff] %vm305_vm1, %v3140_v4  ;;  %2965 = vmatprep.mubr.msk.bf16.mxu1 %vm1022_vm2, %v3063_v17  ;;  %v3090_v44 = vld [vmem:[%s3193_s28 + $0xa0] sm:$0xff]   ;;  %v3092_v46 = vld [vmem:[%s3193_s28 + $0xa8] sm:$0xff]  }
  0x26   : > { %348 = vst.msk [vmem:[%s3198_s5 + $0x150] sm:$0xff] %vm305_vm1, %v3140_v4  ;;  %349 = vst.msk [vmem:[%s3198_s5 + $0x158] sm:$0xff] %vm305_vm1, %v3140_v4  ;;  %v3091_v45 = vld [vmem:[%s3193_s28 + $0x1a0] sm:$0xff]   ;;  %v3093_v47 = vld [vmem:[%s3193_s28 + $0x1a8] sm:$0xff]  }
  0x27   : > { %350 = vst.msk [vmem:[%s3198_s5 + $0x160] sm:$0xff] %vm305_vm1, %v3140_v4  ;;  %351 = vst.msk [vmem:[%s3198_s5 + $0x168] sm:$0xff] %vm305_vm1, %v3140_v4  ;;  %v3094_v48 = vld [vmem:[%s3193_s28 + $0xb0] sm:$0xff]   ;;  %v3096_v50 = vld [vmem:[%s3193_s28 + $0xb8] sm:$0xff]  }
  0x28   : > { %352 = vst.msk [vmem:[%s3198_s5 + $0x170] sm:$0xff] %vm305_vm1, %v3140_v4  ;;  %353 = vst.msk [vmem:[%s3198_s5 + $0x178] sm:$0xff] %vm305_vm1, %v3140_v4  ;;  %v3095_v49 = vld [vmem:[%s3193_s28 + $0x1b0] sm:$0xff]   ;;  %v3097_v51 = vld [vmem:[%s3193_s28 + $0x1b8] sm:$0xff]  }
  0x29   : > { %354 = vst.msk [vmem:[%s3198_s5 + $0x180] sm:$0xff] %vm305_vm1, %v3140_v4  ;;  %355 = vst.msk [vmem:[%s3198_s5 + $0x188] sm:$0xff] %vm305_vm1, %v3140_v4  ;;  %v3098_v52 = vld [vmem:[%s3193_s28 + $0xc0] sm:$0xff]   ;;  %v3100_v54 = vld [vmem:[%s3193_s28 + $0xc8] sm:$0xff]  }
  0x2a   : > { %356 = vst.msk [vmem:[%s3198_s5 + $0x190] sm:$0xff] %vm305_vm1, %v3140_v4  ;;  %357 = vst.msk [vmem:[%s3198_s5 + $0x198] sm:$0xff] %vm305_vm1, %v3140_v4  ;;  %v3099_v53 = vld [vmem:[%s3193_s28 + $0x1c0] sm:$0xff]   ;;  %v3101_v55 = vld [vmem:[%s3193_s28 + $0x1c8] sm:$0xff]  }
  0x2b   : > { %358 = vst.msk [vmem:[%s3198_s5 + $0x1a0] sm:$0xff] %vm305_vm1, %v3140_v4  ;;  %359 = vst.msk [vmem:[%s3198_s5 + $0x1a8] sm:$0xff] %vm305_vm1, %v3140_v4  ;;  %2902 = vmatmul.mubr.msk.bf16.gmra.mrb[12].mxu0 %vm1022_vm2, %v3064_v18  ;;  %v3102_v56 = vld [vmem:[%s3193_s28 + $0xd0] sm:$0xff]   ;;  %v3104_v58 = vld [vmem:[%s3193_s28 + $0xd8] sm:$0xff]  }
  0x2c   : > { %360 = vst.msk [vmem:[%s3198_s5 + $0x1b0] sm:$0xff] %vm305_vm1, %v3140_v4  ;;  %361 = vst.msk [vmem:[%s3198_s5 + $0x1b8] sm:$0xff] %vm305_vm1, %v3140_v4  ;;  %2966 = vmatmul.mubr.msk.bf16.gmra.mrb[12].mxu1 %vm1022_vm2, %v3065_v19  ;;  %2905 = vmatprep.mubr.msk.bf16.mxu0 %vm1022_vm2, %v3066_v20  ;;  %v3103_v57 = vld [vmem:[%s3193_s28 + $0x1d0] sm:$0xff]   ;;  %v3105_v59 = vld [vmem:[%s3193_s28 + $0x1d8] sm:$0xff]  }
  0x2d   : > { %362 = vst.msk [vmem:[%s3198_s5 + $0x1c0] sm:$0xff] %vm305_vm1, %v3140_v4  ;;  %363 = vst.msk [vmem:[%s3198_s5 + $0x1c8] sm:$0xff] %vm305_vm1, %v3140_v4  ;;  %2969 = vmatprep.mubr.msk.bf16.mxu1 %vm1022_vm2, %v3067_v21  ;;  %v3106_v60 = vld [vmem:[%s3193_s28 + $0xe0] sm:$0xff]   ;;  %v3108_v62 = vld [vmem:[%s3193_s28 + $0xe8] sm:$0xff]  }
  0x2e   : > { %364 = vst.msk [vmem:[%s3198_s5 + $0x1d0] sm:$0xff] %vm305_vm1, %v3140_v4  ;;  %365 = vst.msk [vmem:[%s3198_s5 + $0x1d8] sm:$0xff] %vm305_vm1, %v3140_v4  ;;  %v3107_v61 = vld [vmem:[%s3193_s28 + $0x1e0] sm:$0xff]   ;;  %v3109_v63 = vld [vmem:[%s3193_s28 + $0x1e8] sm:$0xff]  }
  0x2f   : > { %366 = vst.msk [vmem:[%s3198_s5 + $0x1e0] sm:$0xff] %vm305_vm1, %v3140_v4  ;;  %367 = vst.msk [vmem:[%s3198_s5 + $0x1e8] sm:$0xff] %vm305_vm1, %v3140_v4  ;;  %v3110_v0 = vld [vmem:[%s3193_s28 + $0xf0] sm:$0xff]   ;;  %v3112_v2 = vld [vmem:[%s3193_s28 + $0xf8] sm:$0xff]  }
  0x30   : > { %368 = vst.msk [vmem:[%s3198_s5 + $0x1f0] sm:$0xff] %vm305_vm1, %v3140_v4  ;;  %369 = vst.msk [vmem:[%s3198_s5 + $0x1f8] sm:$0xff] %vm305_vm1, %v3140_v4  ;;  %v3111_v1 = vld [vmem:[%s3193_s28 + $0x1f0] sm:$0xff]   ;;  %v3113_v3 = vld [vmem:[%s3193_s28 + $0x1f8] sm:$0xff]  }
  0x31   : > { %370 = vst.msk [vmem:[%s3198_s5 + $0x200] sm:$0xff] %vm305_vm1, %v3140_v4  ;;  %371 = vst.msk [vmem:[%s3198_s5 + $0x208] sm:$0xff] %vm305_vm1, %v3140_v4  ;;  %v434_v6 = vld [vmem:[%s3198_s5] sm:$0xff]  ;;  %v437_v9 = vld [vmem:[%s3198_s5 + $0x18] sm:$0xff] }
  0x32   : > { %372 = vst.msk [vmem:[%s3198_s5 + $0x210] sm:$0xff] %vm305_vm1, %v3140_v4  ;;  %373 = vst.msk [vmem:[%s3198_s5 + $0x218] sm:$0xff] %vm305_vm1, %v3140_v4  ;;  %v435_v14 = vld [vmem:[%s3198_s5 + $0x8] sm:$0xff] }
  0x33   : > { %374 = vst.msk [vmem:[%s3198_s5 + $0x220] sm:$0xff] %vm305_vm1, %v3140_v4  ;;  %375 = vst.msk [vmem:[%s3198_s5 + $0x228] sm:$0xff] %vm305_vm1, %v3140_v4  ;;  %2906 = vmatmul.mubr.msk.bf16.gmra.mrb[16].mxu0 %vm1022_vm2, %v3068_v22 }
  0x34   : > { %376 = vst.msk [vmem:[%s3198_s5 + $0x230] sm:$0xff] %vm305_vm1, %v3140_v4  ;;  %377 = vst.msk [vmem:[%s3198_s5 + $0x238] sm:$0xff] %vm305_vm1, %v3140_v4  ;;  %2970 = vmatmul.mubr.msk.bf16.gmra.mrb[16].mxu1 %vm1022_vm2, %v3069_v23  ;;  %2909 = vmatprep.mubr.msk.bf16.mxu0 %vm1022_vm2, %v3070_v24 }
  0x35   : > { %378 = vst.msk [vmem:[%s3198_s5 + $0x240] sm:$0xff] %vm305_vm1, %v3140_v4  ;;  %379 = vst.msk [vmem:[%s3198_s5 + $0x248] sm:$0xff] %vm305_vm1, %v3140_v4  ;;  %2973 = vmatprep.mubr.msk.bf16.mxu1 %vm1022_vm2, %v3071_v25 }
  0x36   : > { %380 = vst.msk [vmem:[%s3198_s5 + $0x250] sm:$0xff] %vm305_vm1, %v3140_v4  ;;  %381 = vst.msk [vmem:[%s3198_s5 + $0x258] sm:$0xff] %vm305_vm1, %v3140_v4 }
  0x37   : > { %382 = vst.msk [vmem:[%s3198_s5 + $0x260] sm:$0xff] %vm305_vm1, %v3140_v4  ;;  %383 = vst.msk [vmem:[%s3198_s5 + $0x268] sm:$0xff] %vm305_vm1, %v3140_v4 }
  0x38   : > { %384 = vst.msk [vmem:[%s3198_s5 + $0x270] sm:$0xff] %vm305_vm1, %v3140_v4  ;;  %385 = vst.msk [vmem:[%s3198_s5 + $0x278] sm:$0xff] %vm305_vm1, %v3140_v4  ;;  %v498_v8 = vld [vmem:[%s3198_s5 + $0x200] sm:$0xff]  ;;  %v499_v19 = vld [vmem:[%s3198_s5 + $0x208] sm:$0xff] }
  0x39   : > { %386 = vst.msk [vmem:[%s3198_s5 + $0x280] sm:$0xff] %vm305_vm1, %v3140_v4  ;;  %387 = vst.msk [vmem:[%s3198_s5 + $0x288] sm:$0xff] %vm305_vm1, %v3140_v4  ;;  %v500_v5 = vld [vmem:[%s3198_s5 + $0x210] sm:$0xff]  ;;  %v501_v13 = vld [vmem:[%s3198_s5 + $0x218] sm:$0xff] }
  0x3a   : > { %388 = vst.msk [vmem:[%s3198_s5 + $0x290] sm:$0xff] %vm305_vm1, %v3140_v4  ;;  %389 = vst.msk [vmem:[%s3198_s5 + $0x298] sm:$0xff] %vm305_vm1, %v3140_v4 }
  0x3b   : > { %390 = vst.msk [vmem:[%s3198_s5 + $0x2a0] sm:$0xff] %vm305_vm1, %v3140_v4  ;;  %391 = vst.msk [vmem:[%s3198_s5 + $0x2a8] sm:$0xff] %vm305_vm1, %v3140_v4  ;;  %2910 = vmatmul.mubr.msk.bf16.gmra.mrb[20].mxu0 %vm1022_vm2, %v3072_v26 }
  0x3c   : > { %392 = vst.msk [vmem:[%s3198_s5 + $0x2b0] sm:$0xff] %vm305_vm1, %v3140_v4  ;;  %393 = vst.msk [vmem:[%s3198_s5 + $0x2b8] sm:$0xff] %vm305_vm1, %v3140_v4  ;;  %2974 = vmatmul.mubr.msk.bf16.gmra.mrb[20].mxu1 %vm1022_vm2, %v3073_v27  ;;  %2913 = vmatprep.mubr.msk.bf16.mxu0 %vm1022_vm2, %v3074_v28  ;;  %v440_v28 = vld [vmem:[%s3198_s5 + $0x30] sm:$0xff] }
  0x3d   : > { %394 = vst.msk [vmem:[%s3198_s5 + $0x2c0] sm:$0xff] %vm305_vm1, %v3140_v4  ;;  %395 = vst.msk [vmem:[%s3198_s5 + $0x2c8] sm:$0xff] %vm305_vm1, %v3140_v4  ;;  %2977 = vmatprep.mubr.msk.bf16.mxu1 %vm1022_vm2, %v3075_v29  ;;  %v504_v29 = vld [vmem:[%s3198_s5 + $0x230] sm:$0xff] }
  0x3e   : > { %396 = vst.msk [vmem:[%s3198_s5 + $0x2d0] sm:$0xff] %vm305_vm1, %v3140_v4  ;;  %397 = vst.msk [vmem:[%s3198_s5 + $0x2d8] sm:$0xff] %vm305_vm1, %v3140_v4 }
  0x3f   : > { %398 = vst.msk [vmem:[%s3198_s5 + $0x2e0] sm:$0xff] %vm305_vm1, %v3140_v4  ;;  %399 = vst.msk [vmem:[%s3198_s5 + $0x2e8] sm:$0xff] %vm305_vm1, %v3140_v4 }
  0x40   : > { %400 = vst.msk [vmem:[%s3198_s5 + $0x2f0] sm:$0xff] %vm305_vm1, %v3140_v4  ;;  %401 = vst.msk [vmem:[%s3198_s5 + $0x2f8] sm:$0xff] %vm305_vm1, %v3140_v4 }
  0x41   : > { %402 = vst.msk [vmem:[%s3198_s5 + $0x300] sm:$0xff] %vm305_vm1, %v3140_v4  ;;  %403 = vst.msk [vmem:[%s3198_s5 + $0x308] sm:$0xff] %vm305_vm1, %v3140_v4 }
  0x42   : > { %404 = vst.msk [vmem:[%s3198_s5 + $0x310] sm:$0xff] %vm305_vm1, %v3140_v4  ;;  %405 = vst.msk [vmem:[%s3198_s5 + $0x318] sm:$0xff] %vm305_vm1, %v3140_v4 }
  0x43   : > { %406 = vst.msk [vmem:[%s3198_s5 + $0x320] sm:$0xff] %vm305_vm1, %v3140_v4  ;;  %407 = vst.msk [vmem:[%s3198_s5 + $0x328] sm:$0xff] %vm305_vm1, %v3140_v4  ;;  %2914 = vmatmul.mubr.msk.bf16.gmra.mrb[24].mxu0 %vm1022_vm2, %v3076_v30  ;;  %v438_v30 = vld [vmem:[%s3198_s5 + $0x20] sm:$0xff] }
  0x44   : > { %408 = vst.msk [vmem:[%s3198_s5 + $0x330] sm:$0xff] %vm305_vm1, %v3140_v4  ;;  %409 = vst.msk [vmem:[%s3198_s5 + $0x338] sm:$0xff] %vm305_vm1, %v3140_v4  ;;  %2978 = vmatmul.mubr.msk.bf16.gmra.mrb[24].mxu1 %vm1022_vm2, %v3077_v31  ;;  %2917 = vmatprep.mubr.msk.bf16.mxu0 %vm1022_vm2, %v3078_v32  ;;  %v3745_v31 = vld [vmem:[%s4770_s2] ss:$0 sm:$0xff] }
  0x45   : > { %410 = vst.msk [vmem:[%s3198_s5 + $0x340] sm:$0xff] %vm305_vm1, %v3140_v4  ;;  %411 = vst.msk [vmem:[%s3198_s5 + $0x348] sm:$0xff] %vm305_vm1, %v3140_v4  ;;  %2981 = vmatprep.mubr.msk.bf16.mxu1 %vm1022_vm2, %v3079_v33  ;;  %v502_v33 = vld [vmem:[%s3198_s5 + $0x220] sm:$0xff] }
  0x46   : > { %412 = vst.msk [vmem:[%s3198_s5 + $0x350] sm:$0xff] %vm305_vm1, %v3140_v4  ;;  %413 = vst.msk [vmem:[%s3198_s5 + $0x358] sm:$0xff] %vm305_vm1, %v3140_v4 }
  0x47   : > { %414 = vst.msk [vmem:[%s3198_s5 + $0x360] sm:$0xff] %vm305_vm1, %v3140_v4  ;;  %415 = vst.msk [vmem:[%s3198_s5 + $0x368] sm:$0xff] %vm305_vm1, %v3140_v4 }
  0x48   : > { %416 = vst.msk [vmem:[%s3198_s5 + $0x370] sm:$0xff] %vm305_vm1, %v3140_v4  ;;  %417 = vst.msk [vmem:[%s3198_s5 + $0x378] sm:$0xff] %vm305_vm1, %v3140_v4 }
  0x49   : > { %418 = vst.msk [vmem:[%s3198_s5 + $0x380] sm:$0xff] %vm305_vm1, %v3140_v4  ;;  %419 = vst.msk [vmem:[%s3198_s5 + $0x388] sm:$0xff] %vm305_vm1, %v3140_v4 }
  0x4a   : > { %420 = vst.msk [vmem:[%s3198_s5 + $0x390] sm:$0xff] %vm305_vm1, %v3140_v4  ;;  %421 = vst.msk [vmem:[%s3198_s5 + $0x398] sm:$0xff] %vm305_vm1, %v3140_v4 }
  0x4b   : > { %422 = vst.msk [vmem:[%s3198_s5 + $0x3a0] sm:$0xff] %vm305_vm1, %v3140_v4  ;;  %423 = vst.msk [vmem:[%s3198_s5 + $0x3a8] sm:$0xff] %vm305_vm1, %v3140_v4  ;;  %2918 = vmatmul.mubr.msk.bf16.gmra.mrb[28].mxu0 %vm1022_vm2, %v3080_v34  ;;  %v441_v34 = vld [vmem:[%s3198_s5 + $0x38] sm:$0xff] }
  0x4c   : > { %424 = vst.msk [vmem:[%s3198_s5 + $0x3b0] sm:$0xff] %vm305_vm1, %v3140_v4  ;;  %425 = vst.msk [vmem:[%s3198_s5 + $0x3b8] sm:$0xff] %vm305_vm1, %v3140_v4  ;;  %2982 = vmatmul.mubr.msk.bf16.gmra.mrb[28].mxu1 %vm1022_vm2, %v3081_v35  ;;  %2921 = vmatprep.mubr.msk.bf16.mxu0 %vm1022_vm2, %v3082_v36 }
  0x4d   : > { %426 = vst.msk [vmem:[%s3198_s5 + $0x3c0] sm:$0xff] %vm305_vm1, %v3140_v4  ;;  %427 = vst.msk [vmem:[%s3198_s5 + $0x3c8] sm:$0xff] %vm305_vm1, %v3140_v4  ;;  %2985 = vmatprep.mubr.msk.bf16.mxu1 %vm1022_vm2, %v3083_v37 }
  0x4e   : > { %428 = vst.msk [vmem:[%s3198_s5 + $0x3d0] sm:$0xff] %vm305_vm1, %v3140_v4  ;;  %429 = vst.msk [vmem:[%s3198_s5 + $0x3d8] sm:$0xff] %vm305_vm1, %v3140_v4 }
  0x4f   : > { %430 = vst.msk [vmem:[%s3198_s5 + $0x3e0] sm:$0xff] %vm305_vm1, %v3140_v4  ;;  %431 = vst.msk [vmem:[%s3198_s5 + $0x3e8] sm:$0xff] %vm305_vm1, %v3140_v4 }
  0x50   : > { %432 = vst.msk [vmem:[%s3198_s5 + $0x3f0] sm:$0xff] %vm305_vm1, %v3140_v4  ;;  %433 = vst.msk [vmem:[%s3198_s5 + $0x3f8] sm:$0xff] %vm305_vm1, %v3140_v4  ;;  %v436_v4 = vld [vmem:[%s3198_s5 + $0x10] sm:$0xff] }
  0x53   : > { %2922 = vmatmul.mubr.msk.bf16.gmra.mrb[32].mxu0 %vm1022_vm2, %v3084_v38  ;;  %v505_v38 = vld [vmem:[%s3198_s5 + $0x238] sm:$0xff] }
  0x54   : > { %2986 = vmatmul.mubr.msk.bf16.gmra.mrb[32].mxu1 %vm1022_vm2, %v3085_v39  ;;  %2925 = vmatprep.mubr.msk.bf16.mxu0 %vm1022_vm2, %v3086_v40  ;;  %v439_v39 = vld [vmem:[%s3198_s5 + $0x28] sm:$0xff] }
  0x55   : > { %2989 = vmatprep.mubr.msk.bf16.mxu1 %vm1022_vm2, %v3087_v41  ;;  %v3755_v41 = vld [vmem:[%s4771_s3] ss:$0 sm:$0xff] }
  0x5b   : > { %2926 = vmatmul.mubr.msk.bf16.gmra.mrb[36].mxu0 %vm1022_vm2, %v3088_v42 }
  0x5c   : > { %2990 = vmatmul.mubr.msk.bf16.gmra.mrb[36].mxu1 %vm1022_vm2, %v3089_v43  ;;  %2929 = vmatprep.mubr.msk.bf16.mxu0 %vm1022_vm2, %v3090_v44 }
  0x5d   : > { %2993 = vmatprep.mubr.msk.bf16.mxu1 %vm1022_vm2, %v3091_v45 }
  0x63   : > { %2930 = vmatmul.mubr.msk.bf16.gmra.mrb[40].mxu0 %vm1022_vm2, %v3092_v46  ;;  %v503_v46 = vld [vmem:[%s3198_s5 + $0x228] sm:$0xff] }
  0x64   : > { %2994 = vmatmul.mubr.msk.bf16.gmra.mrb[40].mxu1 %vm1022_vm2, %v3093_v47  ;;  %2933 = vmatprep.mubr.msk.bf16.mxu0 %vm1022_vm2, %v3094_v48 }
  0x65   : > { %2997 = vmatprep.mubr.msk.bf16.mxu1 %vm1022_vm2, %v3095_v49 }
  0x6b   : > { %2934 = vmatmul.mubr.msk.bf16.gmra.mrb[44].mxu0 %vm1022_vm2, %v3096_v50 }
  0x6c   : > { %2998 = vmatmul.mubr.msk.bf16.gmra.mrb[44].mxu1 %vm1022_vm2, %v3097_v51  ;;  %2937 = vmatprep.mubr.msk.bf16.mxu0 %vm1022_vm2, %v3098_v52 }
  0x6d   : > { %3001 = vmatprep.mubr.msk.bf16.mxu1 %vm1022_vm2, %v3099_v53 }
  0x73   : > { %2938 = vmatmul.mubr.msk.bf16.gmra.mrb[48].mxu0 %vm1022_vm2, %v3100_v54 }
  0x74   : > { %3002 = vmatmul.mubr.msk.bf16.gmra.mrb[48].mxu1 %vm1022_vm2, %v3101_v55  ;;  %2941 = vmatprep.mubr.msk.bf16.mxu0 %vm1022_vm2, %v3102_v56 }
  0x75   : > { %3005 = vmatprep.mubr.msk.bf16.mxu1 %vm1022_vm2, %v3103_v57 }
  0x7b   : > { %2942 = vmatmul.mubr.msk.bf16.gmra.mrb[52].mxu0 %vm1022_vm2, %v3104_v58 }
  0x7c   : > { %3006 = vmatmul.mubr.msk.bf16.gmra.mrb[52].mxu1 %vm1022_vm2, %v3105_v59  ;;  %2945 = vmatprep.mubr.msk.bf16.mxu0 %vm1022_vm2, %v3106_v60 }
  0x7d   : > { %3009 = vmatprep.mubr.msk.bf16.mxu1 %vm1022_vm2, %v3107_v61 }
  0x83   : > { %2946 = vmatmul.mubr.msk.bf16.gmra.mrb[56].mxu0 %vm1022_vm2, %v3108_v62 }
  0x84   : > { %3010 = vmatmul.mubr.msk.bf16.gmra.mrb[56].mxu1 %vm1022_vm2, %v3109_v63  ;;  %2949 = vmatprep.mubr.msk.bf16.mxu0 %vm1022_vm2, %v3110_v0 }
  0x85   : > { %3013 = vmatprep.mubr.msk.bf16.mxu1 %vm1022_vm2, %v3111_v1 }
  0x8b   : > { %2950 = vmatmul.mubr.msk.bf16.gmra.mrb[60].mxu0 %vm1022_vm2, %v3112_v2 }
  0x8c   : > { %3014 = vmatmul.mubr.msk.bf16.gmra.mrb[60].mxu1 %vm1022_vm2, %v3113_v3 }
  0xe6   : > { %v2891_v7 = vpop.f32.mrb[0].mxu0 }
  0xe7   : > { %v1766_v10 = vadd.f32 %v2891_v7, %v436_v4  ;;  %v2955_v11 = vpop.f32.mrb[0].mxu1  ;;  %v1253_v12 = vpop.f32.mrb[1].mxu0 }
  0xe8   : > { %v1830_v15 = vadd.f32 %v2955_v11, %v500_v5  ;;  %v1764_v16 = vadd.f32 %v1253_v12, %v434_v6  ;;  %v1509_v17 = vpop.f32.mrb[1].mxu1  ;;  %v2892_v18 = vpop.f32.mrb[2].mxu0  ;;  %v508_v12 = vld [vmem:[%s3198_s5 + $0x250] sm:$0xff] }
  0xe9   : > { %1895 = vst.msk [vmem:[%s3198_s5 + $0x10] sm:$0xff] %vm305_vm1, %v1766_v10  ;;  %v1828_v20 = vadd.f32 %v1509_v17, %v498_v8  ;;  %v1767_v21 = vadd.f32 %v2892_v18, %v437_v9  ;;  %v2956_v22 = vpop.f32.mrb[2].mxu1  ;;  %v1256_v23 = vpop.f32.mrb[3].mxu0  ;;  %v444_v8 = vld [vmem:[%s3198_s5 + $0x50] sm:$0xff]  ;;  %v506_v17 = vld [vmem:[%s3198_s5 + $0x240] sm:$0xff]  ;;  %v445_v18 = vld [vmem:[%s3198_s5 + $0x58] sm:$0xff] }
  0xea   : > { %1959 = vst.msk [vmem:[%s3198_s5 + $0x210] sm:$0xff] %vm305_vm1, %v1830_v15  ;;  %1893 = vst.msk [vmem:[%s3198_s5] sm:$0xff] %vm305_vm1, %v1764_v16  ;;  %v1831_v24 = vadd.f32 %v2956_v22, %v501_v13  ;;  %v1765_v25 = vadd.f32 %v1256_v23, %v435_v14  ;;  %v1512_v26 = vpop.f32.mrb[3].mxu1  ;;  %v442_v13 = vld [vmem:[%s3198_s5 + $0x40] sm:$0xff]  ;;  %v509_v23 = vld [vmem:[%s3198_s5 + $0x258] sm:$0xff] }
  0xeb   : > { %1957 = vst.msk [vmem:[%s3198_s5 + $0x200] sm:$0xff] %vm305_vm1, %v1828_v20  ;;  %1896 = vst.msk [vmem:[%s3198_s5 + $0x18] sm:$0xff] %vm305_vm1, %v1767_v21  ;;  %v1829_v27 = vadd.f32 %v1512_v26, %v499_v19 }
  0xec   : > { %1960 = vst.msk [vmem:[%s3198_s5 + $0x218] sm:$0xff] %vm305_vm1, %v1831_v24  ;;  %1894 = vst.msk [vmem:[%s3198_s5 + $0x8] sm:$0xff] %vm305_vm1, %v1765_v25  ;;  %v443_v24 = vld [vmem:[%s3198_s5 + $0x48] sm:$0xff] }
  0xed   : > { %1958 = vst.msk [vmem:[%s3198_s5 + $0x208] sm:$0xff] %vm305_vm1, %v1829_v27 }
  0xee   : > { %v2895_v32 = vpop.f32.mrb[4].mxu0 }
  0xef   : > { %v1770_v35 = vadd.f32 %v2895_v32, %v440_v28  ;;  %v2959_v36 = vpop.f32.mrb[4].mxu1  ;;  %v1269_v37 = vpop.f32.mrb[5].mxu0 }
  0xf0   : > { %v2026_v40 = vld [vmem:[%s3198_s5 + $0x10] sm:$0xff]  ;;  %v1834_v42 = vadd.f32 %v2959_v36, %v504_v29  ;;  %v1768_v43 = vadd.f32 %v1269_v37, %v438_v30  ;;  %v1525_v44 = vpop.f32.mrb[5].mxu1  ;;  %v2896_v45 = vpop.f32.mrb[6].mxu0  ;;  %v507_v30 = vld [vmem:[%s3198_s5 + $0x248] sm:$0xff] }
  0xf1   : > { %v2161_v47 = vmul.f32 %v3745_v31, %v2026_v40  ;;  %v2090_v48 = vld [vmem:[%s3198_s5 + $0x210] sm:$0xff]  ;;  %v2024_v49 = vld [vmem:[%s3198_s5] sm:$0xff]  ;;  %1899 = vst.msk [vmem:[%s3198_s5 + $0x30] sm:$0xff] %vm305_vm1, %v1770_v35  ;;  %v1832_v50 = vadd.f32 %v1525_v44, %v502_v33  ;;  %v1771_v51 = vadd.f32 %v2896_v45, %v441_v34  ;;  %v2960_v52 = vpop.f32.mrb[6].mxu1  ;;  %v1272_v53 = vpop.f32.mrb[7].mxu0 }
  0xf2   : > { %v2225_v54 = vmul.f32 %v3745_v31, %v2090_v48  ;;  %v2159_v55 = vmul.f32 %v3745_v31, %v2024_v49  ;;  %v2088_v56 = vld [vmem:[%s3198_s5 + $0x200] sm:$0xff]  ;;  %v2027_v57 = vld [vmem:[%s3198_s5 + $0x18] sm:$0xff]  ;;  %1963 = vst.msk [vmem:[%s3198_s5 + $0x230] sm:$0xff] %vm305_vm1, %v1834_v42  ;;  %1897 = vst.msk [vmem:[%s3198_s5 + $0x20] sm:$0xff] %vm305_vm1, %v1768_v43  ;;  %v1835_v58 = vadd.f32 %v2960_v52, %v505_v38  ;;  %v1528_v60 = vpop.f32.mrb[7].mxu1 }
  0xf3   : > { %v1769_v59 = vadd.f32 %v1272_v53, %v439_v39  ;;  %v2296_v61 = vadd.f32 %v3755_v41, %v2161_v47  ;;  %v2223_v62 = vmul.f32 %v3745_v31, %v2088_v56  ;;  %v2162_v63 = vmul.f32 %v3745_v31, %v2027_v57  ;;  %v2091_v0 = vld [vmem:[%s3198_s5 + $0x218] sm:$0xff]  ;;  %v2025_v1 = vld [vmem:[%s3198_s5 + $0x8] sm:$0xff]  ;;  %1961 = vst.msk [vmem:[%s3198_s5 + $0x220] sm:$0xff] %vm305_vm1, %v1832_v50 }
  0xf4   : > { %1900 = vst.msk [vmem:[%s3198_s5 + $0x38] sm:$0xff] %vm305_vm1, %v1771_v51  ;;  %v1833_v2 = vadd.f32 %v1528_v60, %v503_v46  ;;  %v2360_v3 = vadd.f32 %v3755_v41, %v2225_v54  ;;  %v2294_v4 = vadd.f32 %v3755_v41, %v2159_v55  ;;  %v2226_v5 = vmul.f32 %v3745_v31, %v2091_v0  ;;  %v2089_v7 = vld [vmem:[%s3198_s5 + $0x208] sm:$0xff] }
  0xf5   : > { %v2160_v6 = vmul.f32 %v3745_v31, %v2025_v1  ;;  %1964 = vst.msk [vmem:[%s3198_s5 + $0x238] sm:$0xff] %vm305_vm1, %v1835_v58  ;;  %1898 = vst.msk [vmem:[%s3198_s5 + $0x28] sm:$0xff] %vm305_vm1, %v1769_v59  ;;  %v2358_v9 = vadd.f32 %v3755_v41, %v2223_v62  ;;  %v2297_v10 = vadd.f32 %v3755_v41, %v2162_v63  ;;  %v448_v58 = vld [vmem:[%s3198_s5 + $0x70] sm:$0xff]  ;;  %v446_v63 = vld [vmem:[%s3198_s5 + $0x60] sm:$0xff] }
  0xf6   : > { %2424 = vst.msk [vmem:[%s3198_s5 + $0x10] sm:$0xff] %vm305_vm1, %v2296_v61  ;;  %v2224_v11 = vmul.f32 %v3745_v31, %v2089_v7  ;;  %1962 = vst.msk [vmem:[%s3198_s5 + $0x228] sm:$0xff] %vm305_vm1, %v1833_v2  ;;  %v2361_v14 = vadd.f32 %v3755_v41, %v2226_v5  ;;  %v2899_v16 = vpop.f32.mrb[8].mxu0  ;;  %v512_v62 = vld [vmem:[%s3198_s5 + $0x270] sm:$0xff] }
  0xf7   : > { %2488 = vst.msk [vmem:[%s3198_s5 + $0x210] sm:$0xff] %vm305_vm1, %v2360_v3  ;;  %2422 = vst.msk [vmem:[%s3198_s5] sm:$0xff] %vm305_vm1, %v2294_v4  ;;  %v2295_v15 = vadd.f32 %v3755_v41, %v2160_v6  ;;  %v1774_v20 = vadd.f32 %v2899_v16, %v444_v8  ;;  %v2963_v21 = vpop.f32.mrb[8].mxu1  ;;  %v1285_v22 = vpop.f32.mrb[9].mxu0  ;;  %v510_v3 = vld [vmem:[%s3198_s5 + $0x260] sm:$0xff]  ;;  %v449_v4 = vld [vmem:[%s3198_s5 + $0x78] sm:$0xff] }
  0xf8   : > { %2486 = vst.msk [vmem:[%s3198_s5 + $0x200] sm:$0xff] %vm305_vm1, %v2358_v9  ;;  %2425 = vst.msk [vmem:[%s3198_s5 + $0x18] sm:$0xff] %vm305_vm1, %v2297_v10  ;;  %v2359_v19 = vadd.f32 %v3755_v41, %v2224_v11  ;;  %v2030_v25 = vld [vmem:[%s3198_s5 + $0x30] sm:$0xff]  ;;  %v1838_v26 = vadd.f32 %v2963_v21, %v508_v12  ;;  %v1772_v27 = vadd.f32 %v1285_v22, %v442_v13  ;;  %v1541_v28 = vpop.f32.mrb[9].mxu1  ;;  %v2900_v29 = vpop.f32.mrb[10].mxu0  ;;  %v513_v9 = vld [vmem:[%s3198_s5 + $0x278] sm:$0xff] }
  0xf9   : > { %2489 = vst.msk [vmem:[%s3198_s5 + $0x218] sm:$0xff] %vm305_vm1, %v2361_v14  ;;  %2423 = vst.msk [vmem:[%s3198_s5 + $0x8] sm:$0xff] %vm305_vm1, %v2295_v15  ;;  %v2165_v32 = vmul.f32 %v3745_v31, %v2030_v25  ;;  %v2094_v33 = vld [vmem:[%s3198_s5 + $0x230] sm:$0xff]  ;;  %v2028_v34 = vld [vmem:[%s3198_s5 + $0x20] sm:$0xff]  ;;  %v1836_v35 = vadd.f32 %v1541_v28, %v506_v17  ;;  %v1775_v36 = vadd.f32 %v2900_v29, %v445_v18  ;;  %v2964_v37 = vpop.f32.mrb[10].mxu1  ;;  %v1288_v38 = vpop.f32.mrb[11].mxu0 }
  0xfa   : > { %2487 = vst.msk [vmem:[%s3198_s5 + $0x208] sm:$0xff] %vm305_vm1, %v2359_v19  ;;  %1903 = vst.msk [vmem:[%s3198_s5 + $0x50] sm:$0xff] %vm305_vm1, %v1774_v20  ;;  %v2229_v39 = vmul.f32 %v3745_v31, %v2094_v33  ;;  %v2163_v40 = vmul.f32 %v3745_v31, %v2028_v34  ;;  %v2092_v42 = vld [vmem:[%s3198_s5 + $0x220] sm:$0xff]  ;;  %v1839_v44 = vadd.f32 %v2964_v37, %v509_v23  ;;  %v1544_v46 = vpop.f32.mrb[11].mxu1  ;;  %v447_v10 = vld [vmem:[%s3198_s5 + $0x68] sm:$0xff] }
  0xfb   : > { %v2031_v43 = vld [vmem:[%s3198_s5 + $0x38] sm:$0xff]  ;;  %1967 = vst.msk [vmem:[%s3198_s5 + $0x250] sm:$0xff] %vm305_vm1, %v1838_v26  ;;  %1901 = vst.msk [vmem:[%s3198_s5 + $0x40] sm:$0xff] %vm305_vm1, %v1772_v27  ;;  %v1773_v45 = vadd.f32 %v1288_v38, %v443_v24  ;;  %v2300_v47 = vadd.f32 %v3755_v41, %v2165_v32  ;;  %v2227_v48 = vmul.f32 %v3745_v31, %v2092_v42  ;;  %v511_v16 = vld [vmem:[%s3198_s5 + $0x268] sm:$0xff] }
  0xfc   : > { %v2166_v49 = vmul.f32 %v3745_v31, %v2031_v43  ;;  %v2095_v50 = vld [vmem:[%s3198_s5 + $0x238] sm:$0xff]  ;;  %v2029_v51 = vld [vmem:[%s3198_s5 + $0x28] sm:$0xff]  ;;  %1965 = vst.msk [vmem:[%s3198_s5 + $0x240] sm:$0xff] %vm305_vm1, %v1836_v35  ;;  %1904 = vst.msk [vmem:[%s3198_s5 + $0x58] sm:$0xff] %vm305_vm1, %v1775_v36  ;;  %v1837_v52 = vadd.f32 %v1544_v46, %v507_v30  ;;  %v2364_v53 = vadd.f32 %v3755_v41, %v2229_v39 }
  0xfd   : > { %v2298_v54 = vadd.f32 %v3755_v41, %v2163_v40  ;;  %v2230_v55 = vmul.f32 %v3745_v31, %v2095_v50  ;;  %v2164_v56 = vmul.f32 %v3745_v31, %v2029_v51  ;;  %v2093_v57 = vld [vmem:[%s3198_s5 + $0x228] sm:$0xff]  ;;  %1968 = vst.msk [vmem:[%s3198_s5 + $0x258] sm:$0xff] %vm305_vm1, %v1839_v44  ;;  %1902 = vst.msk [vmem:[%s3198_s5 + $0x48] sm:$0xff] %vm305_vm1, %v1773_v45  ;;  %v452_v44 = vld [vmem:[%s3198_s5 + $0x90] sm:$0xff] }
  0xfe   : > { %2428 = vst.msk [vmem:[%s3198_s5 + $0x30] sm:$0xff] %vm305_vm1, %v2300_v47  ;;  %v2362_v59 = vadd.f32 %v3755_v41, %v2227_v48  ;;  %v2301_v60 = vadd.f32 %v3755_v41, %v2166_v49  ;;  %v2228_v61 = vmul.f32 %v3745_v31, %v2093_v57  ;;  %1966 = vst.msk [vmem:[%s3198_s5 + $0x248] sm:$0xff] %vm305_vm1, %v1837_v52  ;;  %v2903_v2 = vpop.f32.mrb[12].mxu0  ;;  %v516_v48 = vld [vmem:[%s3198_s5 + $0x290] sm:$0xff]  ;;  %v450_v49 = vld [vmem:[%s3198_s5 + $0x80] sm:$0xff] }
  0xff   : > { %2492 = vst.msk [vmem:[%s3198_s5 + $0x230] sm:$0xff] %vm305_vm1, %v2364_v53  ;;  %2426 = vst.msk [vmem:[%s3198_s5 + $0x20] sm:$0xff] %vm305_vm1, %v2298_v54  ;;  %v2365_v0 = vadd.f32 %v3755_v41, %v2230_v55  ;;  %v2299_v1 = vadd.f32 %v3755_v41, %v2164_v56  ;;  %v1778_v6 = vadd.f32 %v2903_v2, %v448_v58  ;;  %v2967_v7 = vpop.f32.mrb[12].mxu1  ;;  %v1301_v8 = vpop.f32.mrb[13].mxu0  ;;  %v514_v53 = vld [vmem:[%s3198_s5 + $0x280] sm:$0xff]  ;;  %v453_v54 = vld [vmem:[%s3198_s5 + $0x98] sm:$0xff] }
 0x100   : > { %2490 = vst.msk [vmem:[%s3198_s5 + $0x220] sm:$0xff] %vm305_vm1, %v2362_v59  ;;  %2429 = vst.msk [vmem:[%s3198_s5 + $0x38] sm:$0xff] %vm305_vm1, %v2301_v60  ;;  %v2363_v5 = vadd.f32 %v3755_v41, %v2228_v61  ;;  %v1842_v12 = vadd.f32 %v2967_v7, %v512_v62  ;;  %v1776_v13 = vadd.f32 %v1301_v8, %v446_v63  ;;  %v1557_v14 = vpop.f32.mrb[13].mxu1  ;;  %v2904_v15 = vpop.f32.mrb[14].mxu0  ;;  %v517_v59 = vld [vmem:[%s3198_s5 + $0x298] sm:$0xff]  ;;  %v451_v60 = vld [vmem:[%s3198_s5 + $0x88] sm:$0xff] }
 0x101   : > { %2493 = vst.msk [vmem:[%s3198_s5 + $0x238] sm:$0xff] %vm305_vm1, %v2365_v0  ;;  %2427 = vst.msk [vmem:[%s3198_s5 + $0x28] sm:$0xff] %vm305_vm1, %v2299_v1  ;;  %v2034_v11 = vld [vmem:[%s3198_s5 + $0x50] sm:$0xff]  ;;  %v1840_v20 = vadd.f32 %v1557_v14, %v510_v3  ;;  %v1779_v21 = vadd.f32 %v2904_v15, %v449_v4  ;;  %v2968_v22 = vpop.f32.mrb[14].mxu1  ;;  %v1304_v23 = vpop.f32.mrb[15].mxu0  ;;  %v515_v2 = vld [vmem:[%s3198_s5 + $0x288] sm:$0xff] }
 0x102   : > { %2491 = vst.msk [vmem:[%s3198_s5 + $0x228] sm:$0xff] %vm305_vm1, %v2363_v5  ;;  %v2169_v17 = vmul.f32 %v3745_v31, %v2034_v11  ;;  %v2098_v18 = vld [vmem:[%s3198_s5 + $0x250] sm:$0xff]  ;;  %v2032_v19 = vld [vmem:[%s3198_s5 + $0x40] sm:$0xff]  ;;  %1907 = vst.msk [vmem:[%s3198_s5 + $0x70] sm:$0xff] %vm305_vm1, %v1778_v6  ;;  %v1843_v28 = vadd.f32 %v2968_v22, %v513_v9  ;;  %v1777_v29 = vadd.f32 %v1304_v23, %v447_v10  ;;  %v1560_v30 = vpop.f32.mrb[15].mxu1 }
 0x103   : > { %v2233_v24 = vmul.f32 %v3745_v31, %v2098_v18  ;;  %v2167_v25 = vmul.f32 %v3745_v31, %v2032_v19  ;;  %v2096_v26 = vld [vmem:[%s3198_s5 + $0x240] sm:$0xff]  ;;  %v2035_v27 = vld [vmem:[%s3198_s5 + $0x58] sm:$0xff]  ;;  %1971 = vst.msk [vmem:[%s3198_s5 + $0x270] sm:$0xff] %vm305_vm1, %v1842_v12  ;;  %1905 = vst.msk [vmem:[%s3198_s5 + $0x60] sm:$0xff] %vm305_vm1, %v1776_v13  ;;  %v1841_v37 = vadd.f32 %v1560_v30, %v511_v16 }
 0x104   : > { %v2304_v32 = vadd.f32 %v3755_v41, %v2169_v17  ;;  %v2231_v33 = vmul.f32 %v3745_v31, %v2096_v26  ;;  %v2170_v34 = vmul.f32 %v3745_v31, %v2035_v27  ;;  %v2099_v35 = vld [vmem:[%s3198_s5 + $0x258] sm:$0xff]  ;;  %v2033_v36 = vld [vmem:[%s3198_s5 + $0x48] sm:$0xff]  ;;  %1969 = vst.msk [vmem:[%s3198_s5 + $0x260] sm:$0xff] %vm305_vm1, %v1840_v20  ;;  %1908 = vst.msk [vmem:[%s3198_s5 + $0x78] sm:$0xff] %vm305_vm1, %v1779_v21 }
 0x105   : > { %v2368_v38 = vadd.f32 %v3755_v41, %v2233_v24  ;;  %v2302_v39 = vadd.f32 %v3755_v41, %v2167_v25  ;;  %v2234_v40 = vmul.f32 %v3745_v31, %v2099_v35  ;;  %v2168_v42 = vmul.f32 %v3745_v31, %v2033_v36  ;;  %v2097_v43 = vld [vmem:[%s3198_s5 + $0x248] sm:$0xff]  ;;  %1972 = vst.msk [vmem:[%s3198_s5 + $0x278] sm:$0xff] %vm305_vm1, %v1843_v28  ;;  %v456_v28 = vld [vmem:[%s3198_s5 + $0xb0] sm:$0xff] }
 0x106   : > { %1906 = vst.msk [vmem:[%s3198_s5 + $0x68] sm:$0xff] %vm305_vm1, %v1777_v29  ;;  %2432 = vst.msk [vmem:[%s3198_s5 + $0x50] sm:$0xff] %vm305_vm1, %v2304_v32  ;;  %v2366_v45 = vadd.f32 %v3755_v41, %v2231_v33  ;;  %v2305_v46 = vadd.f32 %v3755_v41, %v2170_v34  ;;  %v2232_v47 = vmul.f32 %v3745_v31, %v2097_v43  ;;  %v2907_v52 = vpop.f32.mrb[16].mxu0  ;;  %v520_v33 = vld [vmem:[%s3198_s5 + $0x2b0] sm:$0xff]  ;;  %v454_v34 = vld [vmem:[%s3198_s5 + $0xa0] sm:$0xff] }
 0x107   : > { %1970 = vst.msk [vmem:[%s3198_s5 + $0x268] sm:$0xff] %vm305_vm1, %v1841_v37  ;;  %2496 = vst.msk [vmem:[%s3198_s5 + $0x250] sm:$0xff] %vm305_vm1, %v2368_v38  ;;  %v2369_v50 = vadd.f32 %v3755_v41, %v2234_v40  ;;  %v2303_v51 = vadd.f32 %v3755_v41, %v2168_v42  ;;  %v1782_v56 = vadd.f32 %v2907_v52, %v452_v44  ;;  %v2971_v57 = vpop.f32.mrb[16].mxu1  ;;  %v1317_v58 = vpop.f32.mrb[17].mxu0  ;;  %v518_v38 = vld [vmem:[%s3198_s5 + $0x2a0] sm:$0xff]  ;;  %v519_v52 = vld [vmem:[%s3198_s5 + $0x2a8] sm:$0xff] }
 0x108   : > { %2430 = vst.msk [vmem:[%s3198_s5 + $0x40] sm:$0xff] %vm305_vm1, %v2302_v39  ;;  %2494 = vst.msk [vmem:[%s3198_s5 + $0x240] sm:$0xff] %vm305_vm1, %v2366_v45  ;;  %v2367_v55 = vadd.f32 %v3755_v41, %v2232_v47  ;;  %v1846_v62 = vadd.f32 %v2971_v57, %v516_v48  ;;  %v1780_v63 = vadd.f32 %v1317_v58, %v450_v49  ;;  %v1573_v0 = vpop.f32.mrb[17].mxu1  ;;  %v2908_v1 = vpop.f32.mrb[18].mxu0  ;;  %v457_v39 = vld [vmem:[%s3198_s5 + $0xb8] sm:$0xff] }
 0x109   : > { %2433 = vst.msk [vmem:[%s3198_s5 + $0x58] sm:$0xff] %vm305_vm1, %v2305_v46  ;;  %2497 = vst.msk [vmem:[%s3198_s5 + $0x258] sm:$0xff] %vm305_vm1, %v2369_v50  ;;  %v2038_v61 = vld [vmem:[%s3198_s5 + $0x70] sm:$0xff]  ;;  %v1844_v6 = vadd.f32 %v1573_v0, %v514_v53  ;;  %v1783_v7 = vadd.f32 %v2908_v1, %v453_v54  ;;  %v2972_v8 = vpop.f32.mrb[18].mxu1  ;;  %v1320_v9 = vpop.f32.mrb[19].mxu0  ;;  %v521_v45 = vld [vmem:[%s3198_s5 + $0x2b8] sm:$0xff] }
 0x10a   : > { %2431 = vst.msk [vmem:[%s3198_s5 + $0x48] sm:$0xff] %vm305_vm1, %v2303_v51  ;;  %2495 = vst.msk [vmem:[%s3198_s5 + $0x248] sm:$0xff] %vm305_vm1, %v2367_v55  ;;  %v2173_v3 = vmul.f32 %v3745_v31, %v2038_v61  ;;  %v2102_v4 = vld [vmem:[%s3198_s5 + $0x270] sm:$0xff]  ;;  %v2036_v5 = vld [vmem:[%s3198_s5 + $0x60] sm:$0xff]  ;;  %v1847_v14 = vadd.f32 %v2972_v8, %v517_v59  ;;  %v1781_v15 = vadd.f32 %v1320_v9, %v451_v60  ;;  %v1576_v16 = vpop.f32.mrb[19].mxu1 }
 0x10b   : > { %1911 = vst.msk [vmem:[%s3198_s5 + $0x90] sm:$0xff] %vm305_vm1, %v1782_v56  ;;  %v2237_v10 = vmul.f32 %v3745_v31, %v2102_v4  ;;  %v2171_v11 = vmul.f32 %v3745_v31, %v2036_v5  ;;  %v2100_v12 = vld [vmem:[%s3198_s5 + $0x260] sm:$0xff]  ;;  %v2039_v13 = vld [vmem:[%s3198_s5 + $0x78] sm:$0xff]  ;;  %1975 = vst.msk [vmem:[%s3198_s5 + $0x290] sm:$0xff] %vm305_vm1, %v1846_v62  ;;  %v1845_v22 = vadd.f32 %v1576_v16, %v515_v2 }
 0x10c   : > { %1909 = vst.msk [vmem:[%s3198_s5 + $0x80] sm:$0xff] %vm305_vm1, %v1780_v63  ;;  %v2308_v17 = vadd.f32 %v3755_v41, %v2173_v3  ;;  %v2235_v18 = vmul.f32 %v3745_v31, %v2100_v12  ;;  %v2174_v19 = vmul.f32 %v3745_v31, %v2039_v13  ;;  %v2103_v20 = vld [vmem:[%s3198_s5 + $0x278] sm:$0xff]  ;;  %1973 = vst.msk [vmem:[%s3198_s5 + $0x280] sm:$0xff] %vm305_vm1, %v1844_v6  ;;  %v455_v46 = vld [vmem:[%s3198_s5 + $0xa8] sm:$0xff] }
 0x10d   : > { %v2037_v21 = vld [vmem:[%s3198_s5 + $0x68] sm:$0xff]  ;;  %1912 = vst.msk [vmem:[%s3198_s5 + $0x98] sm:$0xff] %vm305_vm1, %v1783_v7  ;;  %v2372_v23 = vadd.f32 %v3755_v41, %v2237_v10  ;;  %v2306_v24 = vadd.f32 %v3755_v41, %v2171_v11  ;;  %v2238_v25 = vmul.f32 %v3745_v31, %v2103_v20  ;;  %1976 = vst.msk [vmem:[%s3198_s5 + $0x298] sm:$0xff] %vm305_vm1, %v1847_v14  ;;  %v460_v14 = vld [vmem:[%s3198_s5 + $0xd0] sm:$0xff] }
 0x10e   : > { %v2172_v26 = vmul.f32 %v3745_v31, %v2037_v21  ;;  %v2101_v27 = vld [vmem:[%s3198_s5 + $0x268] sm:$0xff]  ;;  %1910 = vst.msk [vmem:[%s3198_s5 + $0x88] sm:$0xff] %vm305_vm1, %v1781_v15  ;;  %2436 = vst.msk [vmem:[%s3198_s5 + $0x70] sm:$0xff] %vm305_vm1, %v2308_v17  ;;  %v2370_v29 = vadd.f32 %v3755_v41, %v2235_v18  ;;  %v2309_v30 = vadd.f32 %v3755_v41, %v2174_v19  ;;  %v2911_v37 = vpop.f32.mrb[20].mxu0  ;;  %v524_v18 = vld [vmem:[%s3198_s5 + $0x2d0] sm:$0xff] }
 0x10f   : > { %v2236_v32 = vmul.f32 %v3745_v31, %v2101_v27  ;;  %1974 = vst.msk [vmem:[%s3198_s5 + $0x288] sm:$0xff] %vm305_vm1, %v1845_v22  ;;  %2500 = vst.msk [vmem:[%s3198_s5 + $0x270] sm:$0xff] %vm305_vm1, %v2372_v23  ;;  %v2373_v35 = vadd.f32 %v3755_v41, %v2238_v25  ;;  %v1786_v42 = vadd.f32 %v2911_v37, %v456_v28  ;;  %v2975_v43 = vpop.f32.mrb[20].mxu1  ;;  %v1333_v44 = vpop.f32.mrb[21].mxu0  ;;  %v458_v19 = vld [vmem:[%s3198_s5 + $0xc0] sm:$0xff]  ;;  %v523_v37 = vld [vmem:[%s3198_s5 + $0x2c8] sm:$0xff] }
 0x110   : > { %2434 = vst.msk [vmem:[%s3198_s5 + $0x60] sm:$0xff] %vm305_vm1, %v2306_v24  ;;  %v2307_v36 = vadd.f32 %v3755_v41, %v2172_v26  ;;  %2498 = vst.msk [vmem:[%s3198_s5 + $0x260] sm:$0xff] %vm305_vm1, %v2370_v29  ;;  %v1850_v48 = vadd.f32 %v2975_v43, %v520_v33  ;;  %v1784_v49 = vadd.f32 %v1333_v44, %v454_v34  ;;  %v1589_v50 = vpop.f32.mrb[21].mxu1  ;;  %v2912_v51 = vpop.f32.mrb[22].mxu0  ;;  %v522_v23 = vld [vmem:[%s3198_s5 + $0x2c0] sm:$0xff]  ;;  %v461_v24 = vld [vmem:[%s3198_s5 + $0xd8] sm:$0xff] }
 0x111   : > { %2437 = vst.msk [vmem:[%s3198_s5 + $0x78] sm:$0xff] %vm305_vm1, %v2309_v30  ;;  %v2371_v40 = vadd.f32 %v3755_v41, %v2236_v32  ;;  %2501 = vst.msk [vmem:[%s3198_s5 + $0x278] sm:$0xff] %vm305_vm1, %v2373_v35  ;;  %v1848_v56 = vadd.f32 %v1589_v50, %v518_v38  ;;  %v1787_v57 = vadd.f32 %v2912_v51, %v457_v39  ;;  %v2976_v58 = vpop.f32.mrb[22].mxu1  ;;  %v1336_v59 = vpop.f32.mrb[23].mxu0  ;;  %v525_v29 = vld [vmem:[%s3198_s5 + $0x2d8] sm:$0xff]  ;;  %v459_v30 = vld [vmem:[%s3198_s5 + $0xc8] sm:$0xff] }
 0x112   : > { %2435 = vst.msk [vmem:[%s3198_s5 + $0x68] sm:$0xff] %vm305_vm1, %v2307_v36  ;;  %v2042_v47 = vld [vmem:[%s3198_s5 + $0x90] sm:$0xff]  ;;  %1915 = vst.msk [vmem:[%s3198_s5 + $0xb0] sm:$0xff] %vm305_vm1, %v1786_v42  ;;  %v1851_v0 = vadd.f32 %v2976_v58, %v521_v45  ;;  %v1785_v1 = vadd.f32 %v1336_v59, %v455_v46  ;;  %v1592_v2 = vpop.f32.mrb[23].mxu1 }
 0x113   : > { %2499 = vst.msk [vmem:[%s3198_s5 + $0x268] sm:$0xff] %vm305_vm1, %v2371_v40  ;;  %v2177_v53 = vmul.f32 %v3745_v31, %v2042_v47  ;;  %v2106_v54 = vld [vmem:[%s3198_s5 + $0x290] sm:$0xff]  ;;  %v2040_v55 = vld [vmem:[%s3198_s5 + $0x80] sm:$0xff]  ;;  %1979 = vst.msk [vmem:[%s3198_s5 + $0x2b0] sm:$0xff] %vm305_vm1, %v1850_v48  ;;  %v1849_v8 = vadd.f32 %v1592_v2, %v519_v52 }
 0x114   : > { %v2241_v60 = vmul.f32 %v3745_v31, %v2106_v54  ;;  %v2175_v61 = vmul.f32 %v3745_v31, %v2040_v55  ;;  %v2104_v62 = vld [vmem:[%s3198_s5 + $0x280] sm:$0xff]  ;;  %v2043_v63 = vld [vmem:[%s3198_s5 + $0x98] sm:$0xff]  ;;  %1913 = vst.msk [vmem:[%s3198_s5 + $0xa0] sm:$0xff] %vm305_vm1, %v1784_v49  ;;  %1977 = vst.msk [vmem:[%s3198_s5 + $0x2a0] sm:$0xff] %vm305_vm1, %v1848_v56 }
 0x115   : > { %v2312_v3 = vadd.f32 %v3755_v41, %v2177_v53  ;;  %v2239_v4 = vmul.f32 %v3745_v31, %v2104_v62  ;;  %v2178_v5 = vmul.f32 %v3745_v31, %v2043_v63  ;;  %v2107_v6 = vld [vmem:[%s3198_s5 + $0x298] sm:$0xff]  ;;  %v2041_v7 = vld [vmem:[%s3198_s5 + $0x88] sm:$0xff]  ;;  %1916 = vst.msk [vmem:[%s3198_s5 + $0xb8] sm:$0xff] %vm305_vm1, %v1787_v57  ;;  %1980 = vst.msk [vmem:[%s3198_s5 + $0x2b8] sm:$0xff] %vm305_vm1, %v1851_v0 }
 0x116   : > { %v2376_v9 = vadd.f32 %v3755_v41, %v2241_v60  ;;  %v2310_v10 = vadd.f32 %v3755_v41, %v2175_v61  ;;  %v2242_v11 = vmul.f32 %v3745_v31, %v2107_v6  ;;  %v2176_v12 = vmul.f32 %v3745_v31, %v2041_v7  ;;  %v2105_v13 = vld [vmem:[%s3198_s5 + $0x288] sm:$0xff]  ;;  %1914 = vst.msk [vmem:[%s3198_s5 + $0xa8] sm:$0xff] %vm305_vm1, %v1785_v1  ;;  %v2915_v22 = vpop.f32.mrb[24].mxu0  ;;  %v464_v0 = vld [vmem:[%s3198_s5 + $0xf0] sm:$0xff] }
 0x117   : > { %2440 = vst.msk [vmem:[%s3198_s5 + $0x90] sm:$0xff] %vm305_vm1, %v2312_v3  ;;  %v2374_v15 = vadd.f32 %v3755_v41, %v2239_v4  ;;  %v2313_v16 = vadd.f32 %v3755_v41, %v2178_v5  ;;  %v2240_v17 = vmul.f32 %v3745_v31, %v2105_v13  ;;  %1978 = vst.msk [vmem:[%s3198_s5 + $0x2a8] sm:$0xff] %vm305_vm1, %v1849_v8  ;;  %v2979_v27 = vpop.f32.mrb[24].mxu1  ;;  %v1349_v28 = vpop.f32.mrb[25].mxu0  ;;  %v528_v4 = vld [vmem:[%s3198_s5 + $0x2f0] sm:$0xff]  ;;  %v462_v5 = vld [vmem:[%s3198_s5 + $0xe0] sm:$0xff] }
 0x118   : > { %2504 = vst.msk [vmem:[%s3198_s5 + $0x290] sm:$0xff] %vm305_vm1, %v2376_v9  ;;  %2438 = vst.msk [vmem:[%s3198_s5 + $0x80] sm:$0xff] %vm305_vm1, %v2310_v10  ;;  %v2377_v20 = vadd.f32 %v3755_v41, %v2242_v11  ;;  %v2311_v21 = vadd.f32 %v3755_v41, %v2176_v12  ;;  %v1790_v26 = vadd.f32 %v2915_v22, %v460_v14  ;;  %v1605_v35 = vpop.f32.mrb[25].mxu1  ;;  %v2916_v36 = vpop.f32.mrb[26].mxu0  ;;  %v526_v9 = vld [vmem:[%s3198_s5 + $0x2e0] sm:$0xff]  ;;  %v465_v10 = vld [vmem:[%s3198_s5 + $0xf8] sm:$0xff] }
 0x119   : > { %2502 = vst.msk [vmem:[%s3198_s5 + $0x280] sm:$0xff] %vm305_vm1, %v2374_v15  ;;  %2441 = vst.msk [vmem:[%s3198_s5 + $0x98] sm:$0xff] %vm305_vm1, %v2313_v16  ;;  %v2375_v25 = vadd.f32 %v3755_v41, %v2240_v17  ;;  %v2046_v32 = vld [vmem:[%s3198_s5 + $0xb0] sm:$0xff]  ;;  %v1854_v33 = vadd.f32 %v2979_v27, %v524_v18  ;;  %v1788_v34 = vadd.f32 %v1349_v28, %v458_v19  ;;  %v2980_v44 = vpop.f32.mrb[26].mxu1  ;;  %v1352_v45 = vpop.f32.mrb[27].mxu0  ;;  %v529_v15 = vld [vmem:[%s3198_s5 + $0x2f8] sm:$0xff] }
 0x11a   : > { %2505 = vst.msk [vmem:[%s3198_s5 + $0x298] sm:$0xff] %vm305_vm1, %v2377_v20  ;;  %2439 = vst.msk [vmem:[%s3198_s5 + $0x88] sm:$0xff] %vm305_vm1, %v2311_v21  ;;  %v2181_v38 = vmul.f32 %v3745_v31, %v2046_v32  ;;  %v2110_v39 = vld [vmem:[%s3198_s5 + $0x2b0] sm:$0xff]  ;;  %v1852_v42 = vadd.f32 %v1605_v35, %v522_v23  ;;  %v1791_v43 = vadd.f32 %v2916_v36, %v461_v24  ;;  %v1608_v52 = vpop.f32.mrb[27].mxu1  ;;  %v463_v16 = vld [vmem:[%s3198_s5 + $0xe8] sm:$0xff] }
 0x11b   : > { %2503 = vst.msk [vmem:[%s3198_s5 + $0x288] sm:$0xff] %vm305_vm1, %v2375_v25  ;;  %v2044_v40 = vld [vmem:[%s3198_s5 + $0xa0] sm:$0xff]  ;;  %1919 = vst.msk [vmem:[%s3198_s5 + $0xd0] sm:$0xff] %vm305_vm1, %v1790_v26  ;;  %v2245_v46 = vmul.f32 %v3745_v31, %v2110_v39  ;;  %v1855_v50 = vadd.f32 %v2980_v44, %v525_v29  ;;  %v1789_v51 = vadd.f32 %v1352_v45, %v459_v30  ;;  %v527_v22 = vld [vmem:[%s3198_s5 + $0x2e8] sm:$0xff] }
 0x11c   : > { %v2179_v47 = vmul.f32 %v3745_v31, %v2044_v40  ;;  %v2108_v48 = vld [vmem:[%s3198_s5 + $0x2a0] sm:$0xff]  ;;  %v2047_v49 = vld [vmem:[%s3198_s5 + $0xb8] sm:$0xff]  ;;  %1983 = vst.msk [vmem:[%s3198_s5 + $0x2d0] sm:$0xff] %vm305_vm1, %v1854_v33  ;;  %1917 = vst.msk [vmem:[%s3198_s5 + $0xc0] sm:$0xff] %vm305_vm1, %v1788_v34  ;;  %v2316_v53 = vadd.f32 %v3755_v41, %v2181_v38  ;;  %v1853_v58 = vadd.f32 %v1608_v52, %v523_v37 }
 0x11d   : > { %v2243_v54 = vmul.f32 %v3745_v31, %v2108_v48  ;;  %v2182_v55 = vmul.f32 %v3745_v31, %v2047_v49  ;;  %v2111_v56 = vld [vmem:[%s3198_s5 + $0x2b8] sm:$0xff]  ;;  %v2045_v57 = vld [vmem:[%s3198_s5 + $0xa8] sm:$0xff]  ;;  %1981 = vst.msk [vmem:[%s3198_s5 + $0x2c0] sm:$0xff] %vm305_vm1, %v1852_v42  ;;  %1920 = vst.msk [vmem:[%s3198_s5 + $0xd8] sm:$0xff] %vm305_vm1, %v1791_v43  ;;  %v2380_v59 = vadd.f32 %v3755_v41, %v2245_v46 }
 0x11e   : > { %v2314_v60 = vadd.f32 %v3755_v41, %v2179_v47  ;;  %v2246_v61 = vmul.f32 %v3745_v31, %v2111_v56  ;;  %v2180_v62 = vmul.f32 %v3745_v31, %v2045_v57  ;;  %v2109_v63 = vld [vmem:[%s3198_s5 + $0x2a8] sm:$0xff]  ;;  %1984 = vst.msk [vmem:[%s3198_s5 + $0x2d8] sm:$0xff] %vm305_vm1, %v1855_v50  ;;  %1918 = vst.msk [vmem:[%s3198_s5 + $0xc8] sm:$0xff] %vm305_vm1, %v1789_v51  ;;  %v2919_v8 = vpop.f32.mrb[28].mxu0  ;;  %v468_v50 = vld [vmem:[%s3198_s5 + $0x110] sm:$0xff] }
 0x11f   : > { %2444 = vst.msk [vmem:[%s3198_s5 + $0xb0] sm:$0xff] %vm305_vm1, %v2316_v53  ;;  %v2378_v1 = vadd.f32 %v3755_v41, %v2243_v54  ;;  %v2317_v2 = vadd.f32 %v3755_v41, %v2182_v55  ;;  %v2244_v3 = vmul.f32 %v3745_v31, %v2109_v63  ;;  %1982 = vst.msk [vmem:[%s3198_s5 + $0x2c8] sm:$0xff] %vm305_vm1, %v1853_v58  ;;  %v2983_v13 = vpop.f32.mrb[28].mxu1  ;;  %v1365_v14 = vpop.f32.mrb[29].mxu0  ;;  %v532_v54 = vld [vmem:[%s3198_s5 + $0x310] sm:$0xff]  ;;  %v466_v55 = vld [vmem:[%s3198_s5 + $0x100] sm:$0xff] }
 0x120   : > { %2508 = vst.msk [vmem:[%s3198_s5 + $0x2b0] sm:$0xff] %vm305_vm1, %v2380_v59  ;;  %2442 = vst.msk [vmem:[%s3198_s5 + $0xa0] sm:$0xff] %vm305_vm1, %v2314_v60  ;;  %v2381_v6 = vadd.f32 %v3755_v41, %v2246_v61  ;;  %v2315_v7 = vadd.f32 %v3755_v41, %v2180_v62  ;;  %v1794_v12 = vadd.f32 %v2919_v8, %v464_v0  ;;  %v1621_v20 = vpop.f32.mrb[29].mxu1  ;;  %v2920_v21 = vpop.f32.mrb[30].mxu0  ;;  %v530_v59 = vld [vmem:[%s3198_s5 + $0x300] sm:$0xff]  ;;  %v469_v60 = vld [vmem:[%s3198_s5 + $0x118] sm:$0xff] }
 0x121   : > { %2506 = vst.msk [vmem:[%s3198_s5 + $0x2a0] sm:$0xff] %vm305_vm1, %v2378_v1  ;;  %2445 = vst.msk [vmem:[%s3198_s5 + $0xb8] sm:$0xff] %vm305_vm1, %v2317_v2  ;;  %v2379_v11 = vadd.f32 %v3755_v41, %v2244_v3  ;;  %v1858_v18 = vadd.f32 %v2983_v13, %v528_v4  ;;  %v1792_v19 = vadd.f32 %v1365_v14, %v462_v5  ;;  %v2984_v28 = vpop.f32.mrb[30].mxu1  ;;  %v1368_v29 = vpop.f32.mrb[31].mxu0  ;;  %v533_v1 = vld [vmem:[%s3198_s5 + $0x318] sm:$0xff]  ;;  %v467_v2 = vld [vmem:[%s3198_s5 + $0x108] sm:$0xff] }
 0x122   : > { %2509 = vst.msk [vmem:[%s3198_s5 + $0x2b8] sm:$0xff] %vm305_vm1, %v2381_v6  ;;  %2443 = vst.msk [vmem:[%s3198_s5 + $0xa8] sm:$0xff] %vm305_vm1, %v2315_v7  ;;  %v2050_v17 = vld [vmem:[%s3198_s5 + $0xd0] sm:$0xff]  ;;  %v1856_v26 = vadd.f32 %v1621_v20, %v526_v9  ;;  %v1795_v27 = vadd.f32 %v2920_v21, %v465_v10  ;;  %v1859_v35 = vadd.f32 %v2984_v28, %v529_v15  ;;  %v1624_v37 = vpop.f32.mrb[31].mxu1  ;;  %v531_v8 = vld [vmem:[%s3198_s5 + $0x308] sm:$0xff] }
 0x123   : > { %2507 = vst.msk [vmem:[%s3198_s5 + $0x2a8] sm:$0xff] %vm305_vm1, %v2379_v11  ;;  %v2185_v23 = vmul.f32 %v3745_v31, %v2050_v17  ;;  %v2114_v24 = vld [vmem:[%s3198_s5 + $0x2d0] sm:$0xff]  ;;  %v2048_v25 = vld [vmem:[%s3198_s5 + $0xc0] sm:$0xff]  ;;  %1923 = vst.msk [vmem:[%s3198_s5 + $0xf0] sm:$0xff] %vm305_vm1, %v1794_v12  ;;  %v1793_v36 = vadd.f32 %v1368_v29, %v463_v16  ;;  %v1857_v44 = vadd.f32 %v1624_v37, %v527_v22 }
 0x124   : > { %v2249_v30 = vmul.f32 %v3745_v31, %v2114_v24  ;;  %v2183_v32 = vmul.f32 %v3745_v31, %v2048_v25  ;;  %v2112_v33 = vld [vmem:[%s3198_s5 + $0x2c0] sm:$0xff]  ;;  %v2051_v34 = vld [vmem:[%s3198_s5 + $0xd8] sm:$0xff]  ;;  %1987 = vst.msk [vmem:[%s3198_s5 + $0x2f0] sm:$0xff] %vm305_vm1, %v1858_v18  ;;  %1921 = vst.msk [vmem:[%s3198_s5 + $0xe0] sm:$0xff] %vm305_vm1, %v1792_v19 }
 0x125   : > { %v2320_v38 = vadd.f32 %v3755_v41, %v2185_v23  ;;  %v2247_v39 = vmul.f32 %v3745_v31, %v2112_v33  ;;  %v2186_v40 = vmul.f32 %v3745_v31, %v2051_v34  ;;  %v2115_v42 = vld [vmem:[%s3198_s5 + $0x2d8] sm:$0xff]  ;;  %v2049_v43 = vld [vmem:[%s3198_s5 + $0xc8] sm:$0xff]  ;;  %1985 = vst.msk [vmem:[%s3198_s5 + $0x2e0] sm:$0xff] %vm305_vm1, %v1856_v26  ;;  %1924 = vst.msk [vmem:[%s3198_s5 + $0xf8] sm:$0xff] %vm305_vm1, %v1795_v27 }
 0x126   : > { %v2384_v45 = vadd.f32 %v3755_v41, %v2249_v30  ;;  %v2318_v46 = vadd.f32 %v3755_v41, %v2183_v32  ;;  %v2250_v47 = vmul.f32 %v3745_v31, %v2115_v42  ;;  %v2184_v48 = vmul.f32 %v3745_v31, %v2049_v43  ;;  %v2113_v49 = vld [vmem:[%s3198_s5 + $0x2c8] sm:$0xff]  ;;  %1988 = vst.msk [vmem:[%s3198_s5 + $0x2f8] sm:$0xff] %vm305_vm1, %v1859_v35  ;;  %v2923_v58 = vpop.f32.mrb[32].mxu0  ;;  %v472_v35 = vld [vmem:[%s3198_s5 + $0x130] sm:$0xff] }
 0x127   : > { %1922 = vst.msk [vmem:[%s3198_s5 + $0xe8] sm:$0xff] %vm305_vm1, %v1793_v36  ;;  %2448 = vst.msk [vmem:[%s3198_s5 + $0xd0] sm:$0xff] %vm305_vm1, %v2320_v38  ;;  %v2382_v51 = vadd.f32 %v3755_v41, %v2247_v39  ;;  %v2321_v52 = vadd.f32 %v3755_v41, %v2186_v40  ;;  %v2248_v53 = vmul.f32 %v3745_v31, %v2113_v49  ;;  %v2987_v63 = vpop.f32.mrb[32].mxu1  ;;  %v1381_v0 = vpop.f32.mrb[33].mxu0  ;;  %v536_v39 = vld [vmem:[%s3198_s5 + $0x330] sm:$0xff]  ;;  %v470_v40 = vld [vmem:[%s3198_s5 + $0x120] sm:$0xff] }
 0x128   : > { %1986 = vst.msk [vmem:[%s3198_s5 + $0x2e8] sm:$0xff] %vm305_vm1, %v1857_v44  ;;  %2512 = vst.msk [vmem:[%s3198_s5 + $0x2d0] sm:$0xff] %vm305_vm1, %v2384_v45  ;;  %v2385_v56 = vadd.f32 %v3755_v41, %v2250_v47  ;;  %v2319_v57 = vadd.f32 %v3755_v41, %v2184_v48  ;;  %v1798_v62 = vadd.f32 %v2923_v58, %v468_v50  ;;  %v1637_v6 = vpop.f32.mrb[33].mxu1  ;;  %v2924_v7 = vpop.f32.mrb[34].mxu0  ;;  %v534_v45 = vld [vmem:[%s3198_s5 + $0x320] sm:$0xff]  ;;  %v537_v50 = vld [vmem:[%s3198_s5 + $0x338] sm:$0xff] }
 0x129   : > { %2446 = vst.msk [vmem:[%s3198_s5 + $0xc0] sm:$0xff] %vm305_vm1, %v2318_v46  ;;  %2510 = vst.msk [vmem:[%s3198_s5 + $0x2c0] sm:$0xff] %vm305_vm1, %v2382_v51  ;;  %v2383_v61 = vadd.f32 %v3755_v41, %v2248_v53  ;;  %v1862_v4 = vadd.f32 %v2987_v63, %v532_v54  ;;  %v1796_v5 = vadd.f32 %v1381_v0, %v466_v55  ;;  %v2988_v14 = vpop.f32.mrb[34].mxu1  ;;  %v1384_v15 = vpop.f32.mrb[35].mxu0  ;;  %v471_v51 = vld [vmem:[%s3198_s5 + $0x128] sm:$0xff] }
 0x12a   : > { %2449 = vst.msk [vmem:[%s3198_s5 + $0xd8] sm:$0xff] %vm305_vm1, %v2321_v52  ;;  %2513 = vst.msk [vmem:[%s3198_s5 + $0x2d8] sm:$0xff] %vm305_vm1, %v2385_v56  ;;  %v2054_v3 = vld [vmem:[%s3198_s5 + $0xf0] sm:$0xff]  ;;  %v1860_v12 = vadd.f32 %v1637_v6, %v530_v59  ;;  %v1799_v13 = vadd.f32 %v2924_v7, %v469_v60  ;;  %v1863_v20 = vadd.f32 %v2988_v14, %v533_v1  ;;  %v1640_v22 = vpop.f32.mrb[35].mxu1 }
 0x12b   : > { %2447 = vst.msk [vmem:[%s3198_s5 + $0xc8] sm:$0xff] %vm305_vm1, %v2319_v57  ;;  %2511 = vst.msk [vmem:[%s3198_s5 + $0x2c8] sm:$0xff] %vm305_vm1, %v2383_v61  ;;  %v2189_v9 = vmul.f32 %v3745_v31, %v2054_v3  ;;  %v2118_v10 = vld [vmem:[%s3198_s5 + $0x2f0] sm:$0xff]  ;;  %v2052_v11 = vld [vmem:[%s3198_s5 + $0xe0] sm:$0xff]  ;;  %v1797_v21 = vadd.f32 %v1384_v15, %v467_v2  ;;  %v1861_v28 = vadd.f32 %v1640_v22, %v531_v8 }
 0x12c   : > { %1927 = vst.msk [vmem:[%s3198_s5 + $0x110] sm:$0xff] %vm305_vm1, %v1798_v62  ;;  %v2253_v16 = vmul.f32 %v3745_v31, %v2118_v10  ;;  %v2187_v17 = vmul.f32 %v3745_v31, %v2052_v11  ;;  %v2116_v18 = vld [vmem:[%s3198_s5 + $0x2e0] sm:$0xff]  ;;  %v2055_v19 = vld [vmem:[%s3198_s5 + $0xf8] sm:$0xff]  ;;  %1991 = vst.msk [vmem:[%s3198_s5 + $0x310] sm:$0xff] %vm305_vm1, %v1862_v4 }
 0x12d   : > { %1925 = vst.msk [vmem:[%s3198_s5 + $0x100] sm:$0xff] %vm305_vm1, %v1796_v5  ;;  %v2324_v23 = vadd.f32 %v3755_v41, %v2189_v9  ;;  %v2251_v24 = vmul.f32 %v3745_v31, %v2116_v18  ;;  %v2190_v25 = vmul.f32 %v3745_v31, %v2055_v19  ;;  %v2119_v26 = vld [vmem:[%s3198_s5 + $0x2f8] sm:$0xff]  ;;  %1989 = vst.msk [vmem:[%s3198_s5 + $0x300] sm:$0xff] %vm305_vm1, %v1860_v12  ;;  %v4273_v57 = vld [vmem:[%s4770_s2] ss:$0 sm:$0xff] }
 0x12e   : > { %v2053_v27 = vld [vmem:[%s3198_s5 + $0xe8] sm:$0xff]  ;;  %1928 = vst.msk [vmem:[%s3198_s5 + $0x118] sm:$0xff] %vm305_vm1, %v1799_v13  ;;  %v2388_v29 = vadd.f32 %v3755_v41, %v2253_v16  ;;  %v2322_v30 = vadd.f32 %v3755_v41, %v2187_v17  ;;  %v2254_v32 = vmul.f32 %v3745_v31, %v2119_v26  ;;  %1992 = vst.msk [vmem:[%s3198_s5 + $0x318] sm:$0xff] %vm305_vm1, %v1863_v20  ;;  %v2927_v44 = vpop.f32.mrb[36].mxu0  ;;  %v4291_v8 = vld [vmem:[%s4771_s3] ss:$0 sm:$0xff] }
 0x12f   : > { %v2188_v33 = vmul.f32 %v3745_v31, %v2053_v27  ;;  %v2117_v34 = vld [vmem:[%s3198_s5 + $0x2e8] sm:$0xff]  ;;  %1926 = vst.msk [vmem:[%s3198_s5 + $0x108] sm:$0xff] %vm305_vm1, %v1797_v21  ;;  %2452 = vst.msk [vmem:[%s3198_s5 + $0xf0] sm:$0xff] %vm305_vm1, %v2324_v23  ;;  %v2386_v36 = vadd.f32 %v3755_v41, %v2251_v24  ;;  %v2325_v37 = vadd.f32 %v3755_v41, %v2190_v25  ;;  %v2991_v48 = vpop.f32.mrb[36].mxu1  ;;  %v1397_v49 = vpop.f32.mrb[37].mxu0  ;;  %v476_v20 = vld [vmem:[%s3198_s5 + $0x150] sm:$0xff] }
 0x130   : > { %v2252_v38 = vmul.f32 %v3745_v31, %v2117_v34  ;;  %1990 = vst.msk [vmem:[%s3198_s5 + $0x308] sm:$0xff] %vm305_vm1, %v1861_v28  ;;  %2516 = vst.msk [vmem:[%s3198_s5 + $0x2f0] sm:$0xff] %vm305_vm1, %v2388_v29  ;;  %v2389_v42 = vadd.f32 %v3755_v41, %v2254_v32  ;;  %v473_v31 = vld [vmem:[%s3198_s5 + $0x138] sm:$0xff]  ;;  %v1802_v47 = vadd.f32 %v2927_v44, %v472_v35  ;;  %v1653_v55 = vpop.f32.mrb[37].mxu1  ;;  %v2928_v56 = vpop.f32.mrb[38].mxu0  ;;  %v540_v24 = vld [vmem:[%s3198_s5 + $0x350] sm:$0xff] }
 0x131   : > { %2450 = vst.msk [vmem:[%s3198_s5 + $0xe0] sm:$0xff] %vm305_vm1, %v2322_v30  ;;  %v2323_v43 = vadd.f32 %v3755_v41, %v2188_v33  ;;  %2514 = vst.msk [vmem:[%s3198_s5 + $0x2e0] sm:$0xff] %vm305_vm1, %v2386_v36  ;;  %v1866_v53 = vadd.f32 %v2991_v48, %v536_v39  ;;  %v1800_v54 = vadd.f32 %v1397_v49, %v470_v40  ;;  %v2992_v63 = vpop.f32.mrb[38].mxu1  ;;  %v1400_v0 = vpop.f32.mrb[39].mxu0  ;;  %v474_v25 = vld [vmem:[%s3198_s5 + $0x140] sm:$0xff]  ;;  %v477_v30 = vld [vmem:[%s3198_s5 + $0x158] sm:$0xff] }
 0x132   : > { %2453 = vst.msk [vmem:[%s3198_s5 + $0xf8] sm:$0xff] %vm305_vm1, %v2325_v37  ;;  %v2387_v46 = vadd.f32 %v3755_v41, %v2252_v38  ;;  %2517 = vst.msk [vmem:[%s3198_s5 + $0x2f8] sm:$0xff] %vm305_vm1, %v2389_v42  ;;  %v535_v41 = vld [vmem:[%s3198_s5 + $0x328] sm:$0xff]  ;;  %v1864_v61 = vadd.f32 %v1653_v55, %v534_v45  ;;  %v1803_v62 = vadd.f32 %v2928_v56, %v473_v31  ;;  %v1656_v7 = vpop.f32.mrb[39].mxu1  ;;  %v538_v29 = vld [vmem:[%s3198_s5 + $0x340] sm:$0xff] }
 0x133   : > { %2451 = vst.msk [vmem:[%s3198_s5 + $0xe8] sm:$0xff] %vm305_vm1, %v2323_v43  ;;  %v2058_v52 = vld [vmem:[%s3198_s5 + $0x110] sm:$0xff]  ;;  %1931 = vst.msk [vmem:[%s3198_s5 + $0x130] sm:$0xff] %vm305_vm1, %v1802_v47  ;;  %v1867_v5 = vadd.f32 %v2992_v63, %v537_v50  ;;  %v1801_v6 = vadd.f32 %v1400_v0, %v471_v51  ;;  %v1865_v14 = vadd.f32 %v1656_v7, %v535_v41  ;;  %v541_v36 = vld [vmem:[%s3198_s5 + $0x358] sm:$0xff] }
 0x134   : > { %2515 = vst.msk [vmem:[%s3198_s5 + $0x2e8] sm:$0xff] %vm305_vm1, %v2387_v46  ;;  %v2193_v58 = vmul.f32 %v4273_v57, %v2058_v52  ;;  %v2122_v59 = vld [vmem:[%s3198_s5 + $0x310] sm:$0xff]  ;;  %v2056_v60 = vld [vmem:[%s3198_s5 + $0x100] sm:$0xff]  ;;  %1995 = vst.msk [vmem:[%s3198_s5 + $0x330] sm:$0xff] %vm305_vm1, %v1866_v53 }
 0x135   : > { %v2257_v1 = vmul.f32 %v4273_v57, %v2122_v59  ;;  %v2191_v2 = vmul.f32 %v4273_v57, %v2056_v60  ;;  %v2120_v3 = vld [vmem:[%s3198_s5 + $0x300] sm:$0xff]  ;;  %v2059_v4 = vld [vmem:[%s3198_s5 + $0x118] sm:$0xff]  ;;  %1929 = vst.msk [vmem:[%s3198_s5 + $0x120] sm:$0xff] %vm305_vm1, %v1800_v54  ;;  %1993 = vst.msk [vmem:[%s3198_s5 + $0x320] sm:$0xff] %vm305_vm1, %v1864_v61 }
 0x136   : > { %v2328_v9 = vadd.f32 %v4291_v8, %v2193_v58  ;;  %v2255_v10 = vmul.f32 %v4273_v57, %v2120_v3  ;;  %v2194_v11 = vmul.f32 %v4273_v57, %v2059_v4  ;;  %v2123_v12 = vld [vmem:[%s3198_s5 + $0x318] sm:$0xff]  ;;  %v2057_v13 = vld [vmem:[%s3198_s5 + $0x108] sm:$0xff]  ;;  %1932 = vst.msk [vmem:[%s3198_s5 + $0x138] sm:$0xff] %vm305_vm1, %v1803_v62  ;;  %1996 = vst.msk [vmem:[%s3198_s5 + $0x338] sm:$0xff] %vm305_vm1, %v1867_v5  ;;  %v2931_v28 = vpop.f32.mrb[40].mxu0 }
 0x137   : > { %v2392_v15 = vadd.f32 %v4291_v8, %v2257_v1  ;;  %v2326_v16 = vadd.f32 %v4291_v8, %v2191_v2  ;;  %v2258_v17 = vmul.f32 %v4273_v57, %v2123_v12  ;;  %v2192_v18 = vmul.f32 %v4273_v57, %v2057_v13  ;;  %v2121_v19 = vld [vmem:[%s3198_s5 + $0x308] sm:$0xff]  ;;  %1930 = vst.msk [vmem:[%s3198_s5 + $0x128] sm:$0xff] %vm305_vm1, %v1801_v6  ;;  %v2995_v34 = vpop.f32.mrb[40].mxu1  ;;  %v1413_v35 = vpop.f32.mrb[41].mxu0  ;;  %v480_v5 = vld [vmem:[%s3198_s5 + $0x170] sm:$0xff] }
 0x138   : > { %2456 = vst.msk [vmem:[%s3198_s5 + $0x110] sm:$0xff] %vm305_vm1, %v2328_v9  ;;  %v2390_v21 = vadd.f32 %v4291_v8, %v2255_v10  ;;  %v2329_v22 = vadd.f32 %v4291_v8, %v2194_v11  ;;  %v2256_v23 = vmul.f32 %v4273_v57, %v2121_v19  ;;  %1994 = vst.msk [vmem:[%s3198_s5 + $0x328] sm:$0xff] %vm305_vm1, %v1865_v14  ;;  %v475_v37 = vld [vmem:[%s3198_s5 + $0x148] sm:$0xff]  ;;  %v1669_v42 = vpop.f32.mrb[41].mxu1  ;;  %v2932_v43 = vpop.f32.mrb[42].mxu0  ;;  %v544_v10 = vld [vmem:[%s3198_s5 + $0x370] sm:$0xff] }
 0x139   : > { %2520 = vst.msk [vmem:[%s3198_s5 + $0x310] sm:$0xff] %vm305_vm1, %v2392_v15  ;;  %2454 = vst.msk [vmem:[%s3198_s5 + $0x100] sm:$0xff] %vm305_vm1, %v2326_v16  ;;  %v2393_v26 = vadd.f32 %v4291_v8, %v2258_v17  ;;  %v2327_v27 = vadd.f32 %v4291_v8, %v2192_v18  ;;  %v1806_v33 = vadd.f32 %v2931_v28, %v476_v20  ;;  %v539_v44 = vld [vmem:[%s3198_s5 + $0x348] sm:$0xff]  ;;  %v2996_v49 = vpop.f32.mrb[42].mxu1  ;;  %v1416_v50 = vpop.f32.mrb[43].mxu0  ;;  %v478_v11 = vld [vmem:[%s3198_s5 + $0x160] sm:$0xff] }
 0x13a   : > { %2518 = vst.msk [vmem:[%s3198_s5 + $0x300] sm:$0xff] %vm305_vm1, %v2390_v21  ;;  %2457 = vst.msk [vmem:[%s3198_s5 + $0x118] sm:$0xff] %vm305_vm1, %v2329_v22  ;;  %v2391_v32 = vadd.f32 %v4291_v8, %v2256_v23  ;;  %v2062_v38 = vld [vmem:[%s3198_s5 + $0x130] sm:$0xff]  ;;  %v1870_v39 = vadd.f32 %v2995_v34, %v540_v24  ;;  %v1804_v40 = vadd.f32 %v1413_v35, %v474_v25  ;;  %v1672_v41 = vpop.f32.mrb[43].mxu1  ;;  %v542_v15 = vld [vmem:[%s3198_s5 + $0x360] sm:$0xff] }
 0x13b   : > { %2521 = vst.msk [vmem:[%s3198_s5 + $0x318] sm:$0xff] %vm305_vm1, %v2393_v26  ;;  %2455 = vst.msk [vmem:[%s3198_s5 + $0x108] sm:$0xff] %vm305_vm1, %v2327_v27  ;;  %v2197_v45 = vmul.f32 %v4273_v57, %v2062_v38  ;;  %v2126_v31 = vld [vmem:[%s3198_s5 + $0x330] sm:$0xff]  ;;  %v1868_v47 = vadd.f32 %v1669_v42, %v538_v29  ;;  %v1807_v48 = vadd.f32 %v2932_v43, %v477_v30  ;;  %v481_v16 = vld [vmem:[%s3198_s5 + $0x178] sm:$0xff] }
 0x13c   : > { %2519 = vst.msk [vmem:[%s3198_s5 + $0x308] sm:$0xff] %vm305_vm1, %v2391_v32  ;;  %v2060_v46 = vld [vmem:[%s3198_s5 + $0x120] sm:$0xff]  ;;  %1935 = vst.msk [vmem:[%s3198_s5 + $0x150] sm:$0xff] %vm305_vm1, %v1806_v33  ;;  %v2261_v51 = vmul.f32 %v4273_v57, %v2126_v31  ;;  %v1871_v55 = vadd.f32 %v2996_v49, %v541_v36  ;;  %v1805_v56 = vadd.f32 %v1416_v50, %v475_v37  ;;  %v545_v21 = vld [vmem:[%s3198_s5 + $0x378] sm:$0xff] }
 0x13d   : > { %v2195_v52 = vmul.f32 %v4273_v57, %v2060_v46  ;;  %v2124_v53 = vld [vmem:[%s3198_s5 + $0x320] sm:$0xff]  ;;  %v2063_v54 = vld [vmem:[%s3198_s5 + $0x138] sm:$0xff]  ;;  %1999 = vst.msk [vmem:[%s3198_s5 + $0x350] sm:$0xff] %vm305_vm1, %v1870_v39  ;;  %1933 = vst.msk [vmem:[%s3198_s5 + $0x140] sm:$0xff] %vm305_vm1, %v1804_v40  ;;  %v2332_v58 = vadd.f32 %v4291_v8, %v2197_v45  ;;  %v1869_v63 = vadd.f32 %v1672_v41, %v539_v44 }
 0x13e   : > { %v2259_v59 = vmul.f32 %v4273_v57, %v2124_v53  ;;  %v2198_v60 = vmul.f32 %v4273_v57, %v2063_v54  ;;  %v2127_v61 = vld [vmem:[%s3198_s5 + $0x338] sm:$0xff]  ;;  %v2061_v62 = vld [vmem:[%s3198_s5 + $0x128] sm:$0xff]  ;;  %1997 = vst.msk [vmem:[%s3198_s5 + $0x340] sm:$0xff] %vm305_vm1, %v1868_v47  ;;  %1936 = vst.msk [vmem:[%s3198_s5 + $0x158] sm:$0xff] %vm305_vm1, %v1807_v48  ;;  %v2396_v0 = vadd.f32 %v4291_v8, %v2261_v51  ;;  %v2935_v14 = vpop.f32.mrb[44].mxu0 }
 0x13f   : > { %v2330_v1 = vadd.f32 %v4291_v8, %v2195_v52  ;;  %v2262_v2 = vmul.f32 %v4273_v57, %v2127_v61  ;;  %v2196_v3 = vmul.f32 %v4273_v57, %v2061_v62  ;;  %v2125_v4 = vld [vmem:[%s3198_s5 + $0x328] sm:$0xff]  ;;  %2000 = vst.msk [vmem:[%s3198_s5 + $0x358] sm:$0xff] %vm305_vm1, %v1871_v55  ;;  %1934 = vst.msk [vmem:[%s3198_s5 + $0x148] sm:$0xff] %vm305_vm1, %v1805_v56  ;;  %v2999_v19 = vpop.f32.mrb[44].mxu1  ;;  %v1429_v20 = vpop.f32.mrb[45].mxu0  ;;  %v484_v55 = vld [vmem:[%s3198_s5 + $0x190] sm:$0xff] }
 0x140   : > { %2460 = vst.msk [vmem:[%s3198_s5 + $0x130] sm:$0xff] %vm305_vm1, %v2332_v58  ;;  %v2394_v6 = vadd.f32 %v4291_v8, %v2259_v59  ;;  %v2333_v7 = vadd.f32 %v4291_v8, %v2198_v60  ;;  %v2260_v9 = vmul.f32 %v4273_v57, %v2125_v4  ;;  %1998 = vst.msk [vmem:[%s3198_s5 + $0x348] sm:$0xff] %vm305_vm1, %v1869_v63  ;;  %v479_v22 = vld [vmem:[%s3198_s5 + $0x168] sm:$0xff]  ;;  %v1685_v26 = vpop.f32.mrb[45].mxu1  ;;  %v2936_v27 = vpop.f32.mrb[46].mxu0  ;;  %v548_v59 = vld [vmem:[%s3198_s5 + $0x390] sm:$0xff] }
 0x141   : > { %2524 = vst.msk [vmem:[%s3198_s5 + $0x330] sm:$0xff] %vm305_vm1, %v2396_v0  ;;  %2458 = vst.msk [vmem:[%s3198_s5 + $0x120] sm:$0xff] %vm305_vm1, %v2330_v1  ;;  %v2397_v12 = vadd.f32 %v4291_v8, %v2262_v2  ;;  %v2331_v13 = vadd.f32 %v4291_v8, %v2196_v3  ;;  %v1810_v18 = vadd.f32 %v2935_v14, %v480_v5  ;;  %v543_v28 = vld [vmem:[%s3198_s5 + $0x368] sm:$0xff]  ;;  %v3000_v35 = vpop.f32.mrb[46].mxu1  ;;  %v1432_v36 = vpop.f32.mrb[47].mxu0  ;;  %v482_v60 = vld [vmem:[%s3198_s5 + $0x180] sm:$0xff] }
 0x142   : > { %2522 = vst.msk [vmem:[%s3198_s5 + $0x320] sm:$0xff] %vm305_vm1, %v2394_v6  ;;  %2461 = vst.msk [vmem:[%s3198_s5 + $0x138] sm:$0xff] %vm305_vm1, %v2333_v7  ;;  %v2395_v17 = vadd.f32 %v4291_v8, %v2260_v9  ;;  %v1874_v24 = vadd.f32 %v2999_v19, %v544_v10  ;;  %v1808_v25 = vadd.f32 %v1429_v20, %v478_v11  ;;  %v1688_v44 = vpop.f32.mrb[47].mxu1  ;;  %v546_v0 = vld [vmem:[%s3198_s5 + $0x380] sm:$0xff]  ;;  %v485_v1 = vld [vmem:[%s3198_s5 + $0x198] sm:$0xff] }
 0x143   : > { %2525 = vst.msk [vmem:[%s3198_s5 + $0x338] sm:$0xff] %vm305_vm1, %v2397_v12  ;;  %2459 = vst.msk [vmem:[%s3198_s5 + $0x128] sm:$0xff] %vm305_vm1, %v2331_v13  ;;  %v2066_v23 = vld [vmem:[%s3198_s5 + $0x150] sm:$0xff]  ;;  %v1872_v33 = vadd.f32 %v1685_v26, %v542_v15  ;;  %v1811_v34 = vadd.f32 %v2936_v27, %v481_v16  ;;  %v1875_v42 = vadd.f32 %v3000_v35, %v545_v21  ;;  %v549_v6 = vld [vmem:[%s3198_s5 + $0x398] sm:$0xff] }
 0x144   : > { %2523 = vst.msk [vmem:[%s3198_s5 + $0x328] sm:$0xff] %vm305_vm1, %v2395_v17  ;;  %v2201_v29 = vmul.f32 %v4273_v57, %v2066_v23  ;;  %v2130_v30 = vld [vmem:[%s3198_s5 + $0x350] sm:$0xff]  ;;  %v2064_v32 = vld [vmem:[%s3198_s5 + $0x140] sm:$0xff]  ;;  %1939 = vst.msk [vmem:[%s3198_s5 + $0x170] sm:$0xff] %vm305_vm1, %v1810_v18  ;;  %v1809_v43 = vadd.f32 %v1432_v36, %v479_v22  ;;  %v1873_v49 = vadd.f32 %v1688_v44, %v543_v28 }
 0x145   : > { %v2265_v37 = vmul.f32 %v4273_v57, %v2130_v30  ;;  %v2199_v38 = vmul.f32 %v4273_v57, %v2064_v32  ;;  %v2128_v39 = vld [vmem:[%s3198_s5 + $0x340] sm:$0xff]  ;;  %v2067_v40 = vld [vmem:[%s3198_s5 + $0x158] sm:$0xff]  ;;  %2003 = vst.msk [vmem:[%s3198_s5 + $0x370] sm:$0xff] %vm305_vm1, %v1874_v24  ;;  %1937 = vst.msk [vmem:[%s3198_s5 + $0x160] sm:$0xff] %vm305_vm1, %v1808_v25 }
 0x146   : > { %v2336_v45 = vadd.f32 %v4291_v8, %v2201_v29  ;;  %v2263_v31 = vmul.f32 %v4273_v57, %v2128_v39  ;;  %v2202_v46 = vmul.f32 %v4273_v57, %v2067_v40  ;;  %v2131_v47 = vld [vmem:[%s3198_s5 + $0x358] sm:$0xff]  ;;  %v2065_v48 = vld [vmem:[%s3198_s5 + $0x148] sm:$0xff]  ;;  %2001 = vst.msk [vmem:[%s3198_s5 + $0x360] sm:$0xff] %vm305_vm1, %v1872_v33  ;;  %1940 = vst.msk [vmem:[%s3198_s5 + $0x178] sm:$0xff] %vm305_vm1, %v1811_v34  ;;  %v2939_v63 = vpop.f32.mrb[48].mxu0 }
 0x147   : > { %v2400_v50 = vadd.f32 %v4291_v8, %v2265_v37  ;;  %v2334_v51 = vadd.f32 %v4291_v8, %v2199_v38  ;;  %v2266_v52 = vmul.f32 %v4273_v57, %v2131_v47  ;;  %v2200_v53 = vmul.f32 %v4273_v57, %v2065_v48  ;;  %v2129_v54 = vld [vmem:[%s3198_s5 + $0x348] sm:$0xff]  ;;  %2004 = vst.msk [vmem:[%s3198_s5 + $0x378] sm:$0xff] %vm305_vm1, %v1875_v42  ;;  %v3003_v4 = vpop.f32.mrb[48].mxu1  ;;  %v1445_v5 = vpop.f32.mrb[49].mxu0  ;;  %v488_v42 = vld [vmem:[%s3198_s5 + $0x1b0] sm:$0xff] }
 0x148   : > { %1938 = vst.msk [vmem:[%s3198_s5 + $0x168] sm:$0xff] %vm305_vm1, %v1809_v43  ;;  %2464 = vst.msk [vmem:[%s3198_s5 + $0x150] sm:$0xff] %vm305_vm1, %v2336_v45  ;;  %v2398_v56 = vadd.f32 %v4291_v8, %v2263_v31  ;;  %v2337_v41 = vadd.f32 %v4291_v8, %v2202_v46  ;;  %v2264_v58 = vmul.f32 %v4273_v57, %v2129_v54  ;;  %v483_v7 = vld [vmem:[%s3198_s5 + $0x188] sm:$0xff]  ;;  %v1701_v12 = vpop.f32.mrb[49].mxu1  ;;  %v2940_v13 = vpop.f32.mrb[50].mxu0  ;;  %v552_v31 = vld [vmem:[%s3198_s5 + $0x3b0] sm:$0xff] }
 0x149   : > { %2002 = vst.msk [vmem:[%s3198_s5 + $0x368] sm:$0xff] %vm305_vm1, %v1873_v49  ;;  %2528 = vst.msk [vmem:[%s3198_s5 + $0x350] sm:$0xff] %vm305_vm1, %v2400_v50  ;;  %v2401_v61 = vadd.f32 %v4291_v8, %v2266_v52  ;;  %v2335_v62 = vadd.f32 %v4291_v8, %v2200_v53  ;;  %v1814_v3 = vadd.f32 %v2939_v63, %v484_v55  ;;  %v547_v14 = vld [vmem:[%s3198_s5 + $0x388] sm:$0xff]  ;;  %v3004_v20 = vpop.f32.mrb[50].mxu1  ;;  %v1448_v21 = vpop.f32.mrb[51].mxu0  ;;  %v486_v46 = vld [vmem:[%s3198_s5 + $0x1a0] sm:$0xff] }
 0x14a   : > { %2462 = vst.msk [vmem:[%s3198_s5 + $0x140] sm:$0xff] %vm305_vm1, %v2334_v51  ;;  %2526 = vst.msk [vmem:[%s3198_s5 + $0x340] sm:$0xff] %vm305_vm1, %v2398_v56  ;;  %v2399_v2 = vadd.f32 %v4291_v8, %v2264_v58  ;;  %v1878_v10 = vadd.f32 %v3003_v4, %v548_v59  ;;  %v1812_v11 = vadd.f32 %v1445_v5, %v482_v60  ;;  %v1704_v28 = vpop.f32.mrb[51].mxu1  ;;  %v550_v50 = vld [vmem:[%s3198_s5 + $0x3a0] sm:$0xff]  ;;  %v489_v51 = vld [vmem:[%s3198_s5 + $0x1b8] sm:$0xff] }
 0x14b   : > { %2465 = vst.msk [vmem:[%s3198_s5 + $0x158] sm:$0xff] %vm305_vm1, %v2337_v41  ;;  %2529 = vst.msk [vmem:[%s3198_s5 + $0x358] sm:$0xff] %vm305_vm1, %v2401_v61  ;;  %v2070_v9 = vld [vmem:[%s3198_s5 + $0x170] sm:$0xff]  ;;  %v1876_v18 = vadd.f32 %v1701_v12, %v546_v0  ;;  %v1815_v19 = vadd.f32 %v2940_v13, %v485_v1  ;;  %v1879_v26 = vadd.f32 %v3004_v20, %v549_v6  ;;  %v553_v56 = vld [vmem:[%s3198_s5 + $0x3b8] sm:$0xff] }
 0x14c   : > { %2463 = vst.msk [vmem:[%s3198_s5 + $0x148] sm:$0xff] %vm305_vm1, %v2335_v62  ;;  %2527 = vst.msk [vmem:[%s3198_s5 + $0x348] sm:$0xff] %vm305_vm1, %v2399_v2  ;;  %v2205_v15 = vmul.f32 %v4273_v57, %v2070_v9  ;;  %v2134_v16 = vld [vmem:[%s3198_s5 + $0x370] sm:$0xff]  ;;  %v2068_v17 = vld [vmem:[%s3198_s5 + $0x160] sm:$0xff]  ;;  %v1813_v27 = vadd.f32 %v1448_v21, %v483_v7  ;;  %v1877_v35 = vadd.f32 %v1704_v28, %v547_v14 }
 0x14d   : > { %1943 = vst.msk [vmem:[%s3198_s5 + $0x190] sm:$0xff] %vm305_vm1, %v1814_v3  ;;  %v2269_v22 = vmul.f32 %v4273_v57, %v2134_v16  ;;  %v2203_v23 = vmul.f32 %v4273_v57, %v2068_v17  ;;  %v2132_v24 = vld [vmem:[%s3198_s5 + $0x360] sm:$0xff]  ;;  %v2071_v25 = vld [vmem:[%s3198_s5 + $0x178] sm:$0xff]  ;;  %2007 = vst.msk [vmem:[%s3198_s5 + $0x390] sm:$0xff] %vm305_vm1, %v1878_v10 }
 0x14e   : > { %1941 = vst.msk [vmem:[%s3198_s5 + $0x180] sm:$0xff] %vm305_vm1, %v1812_v11  ;;  %v2340_v29 = vadd.f32 %v4291_v8, %v2205_v15  ;;  %v2267_v30 = vmul.f32 %v4273_v57, %v2132_v24  ;;  %v2206_v32 = vmul.f32 %v4273_v57, %v2071_v25  ;;  %v2135_v33 = vld [vmem:[%s3198_s5 + $0x378] sm:$0xff]  ;;  %2005 = vst.msk [vmem:[%s3198_s5 + $0x380] sm:$0xff] %vm305_vm1, %v1876_v18  ;;  %v2943_v49 = vpop.f32.mrb[52].mxu0  ;;  %v487_v41 = vld [vmem:[%s3198_s5 + $0x1a8] sm:$0xff] }
 0x14f   : > { %v2069_v34 = vld [vmem:[%s3198_s5 + $0x168] sm:$0xff]  ;;  %1944 = vst.msk [vmem:[%s3198_s5 + $0x198] sm:$0xff] %vm305_vm1, %v1815_v19  ;;  %v2404_v36 = vadd.f32 %v4291_v8, %v2269_v22  ;;  %v2338_v37 = vadd.f32 %v4291_v8, %v2203_v23  ;;  %v2270_v38 = vmul.f32 %v4273_v57, %v2135_v33  ;;  %2008 = vst.msk [vmem:[%s3198_s5 + $0x398] sm:$0xff] %vm305_vm1, %v1879_v26  ;;  %v3007_v54 = vpop.f32.mrb[52].mxu1  ;;  %v1461_v55 = vpop.f32.mrb[53].mxu0  ;;  %v492_v26 = vld [vmem:[%s3198_s5 + $0x1d0] sm:$0xff] }
 0x150   : > { %v2204_v39 = vmul.f32 %v4273_v57, %v2069_v34  ;;  %v2133_v40 = vld [vmem:[%s3198_s5 + $0x368] sm:$0xff]  ;;  %1942 = vst.msk [vmem:[%s3198_s5 + $0x188] sm:$0xff] %vm305_vm1, %v1813_v27  ;;  %2468 = vst.msk [vmem:[%s3198_s5 + $0x170] sm:$0xff] %vm305_vm1, %v2340_v29  ;;  %v2402_v43 = vadd.f32 %v4291_v8, %v2267_v30  ;;  %v2341_v44 = vadd.f32 %v4291_v8, %v2206_v32  ;;  %v1717_v61 = vpop.f32.mrb[53].mxu1  ;;  %v2944_v62 = vpop.f32.mrb[54].mxu0  ;;  %v556_v30 = vld [vmem:[%s3198_s5 + $0x3d0] sm:$0xff] }
 0x151   : > { %v2268_v45 = vmul.f32 %v4273_v57, %v2133_v40  ;;  %2006 = vst.msk [vmem:[%s3198_s5 + $0x388] sm:$0xff] %vm305_vm1, %v1877_v35  ;;  %2532 = vst.msk [vmem:[%s3198_s5 + $0x370] sm:$0xff] %vm305_vm1, %v2404_v36  ;;  %v2405_v47 = vadd.f32 %v4291_v8, %v2270_v38  ;;  %v1818_v53 = vadd.f32 %v2943_v49, %v488_v42  ;;  %v551_v63 = vld [vmem:[%s3198_s5 + $0x3a8] sm:$0xff]  ;;  %v3008_v5 = vpop.f32.mrb[54].mxu1  ;;  %v1464_v6 = vpop.f32.mrb[55].mxu0  ;;  %v490_v32 = vld [vmem:[%s3198_s5 + $0x1c0] sm:$0xff] }
 0x152   : > { %2466 = vst.msk [vmem:[%s3198_s5 + $0x160] sm:$0xff] %vm305_vm1, %v2338_v37  ;;  %v2339_v48 = vadd.f32 %v4291_v8, %v2204_v39  ;;  %2530 = vst.msk [vmem:[%s3198_s5 + $0x360] sm:$0xff] %vm305_vm1, %v2402_v43  ;;  %v1882_v59 = vadd.f32 %v3007_v54, %v552_v31  ;;  %v1816_v60 = vadd.f32 %v1461_v55, %v486_v46  ;;  %v1720_v14 = vpop.f32.mrb[55].mxu1  ;;  %v554_v36 = vld [vmem:[%s3198_s5 + $0x3c0] sm:$0xff]  ;;  %v493_v37 = vld [vmem:[%s3198_s5 + $0x1d8] sm:$0xff] }
 0x153   : > { %2469 = vst.msk [vmem:[%s3198_s5 + $0x178] sm:$0xff] %vm305_vm1, %v2341_v44  ;;  %v2403_v52 = vadd.f32 %v4291_v8, %v2268_v45  ;;  %2533 = vst.msk [vmem:[%s3198_s5 + $0x378] sm:$0xff] %vm305_vm1, %v2405_v47  ;;  %v1880_v3 = vadd.f32 %v1717_v61, %v550_v50  ;;  %v1819_v4 = vadd.f32 %v2944_v62, %v489_v51  ;;  %v557_v43 = vld [vmem:[%s3198_s5 + $0x3d8] sm:$0xff]  ;;  %v491_v44 = vld [vmem:[%s3198_s5 + $0x1c8] sm:$0xff] }
 0x154   : > { %2467 = vst.msk [vmem:[%s3198_s5 + $0x168] sm:$0xff] %vm305_vm1, %v2339_v48  ;;  %v2074_v58 = vld [vmem:[%s3198_s5 + $0x190] sm:$0xff]  ;;  %1947 = vst.msk [vmem:[%s3198_s5 + $0x1b0] sm:$0xff] %vm305_vm1, %v1818_v53  ;;  %v1883_v12 = vadd.f32 %v3008_v5, %v553_v56  ;;  %v1817_v13 = vadd.f32 %v1464_v6, %v487_v41  ;;  %v1881_v20 = vadd.f32 %v1720_v14, %v551_v63  ;;  %v555_v49 = vld [vmem:[%s3198_s5 + $0x3c8] sm:$0xff] }
 0x155   : > { %2531 = vst.msk [vmem:[%s3198_s5 + $0x368] sm:$0xff] %vm305_vm1, %v2403_v52  ;;  %v2209_v0 = vmul.f32 %v4273_v57, %v2074_v58  ;;  %v2138_v1 = vld [vmem:[%s3198_s5 + $0x390] sm:$0xff]  ;;  %v2072_v2 = vld [vmem:[%s3198_s5 + $0x180] sm:$0xff]  ;;  %2011 = vst.msk [vmem:[%s3198_s5 + $0x3b0] sm:$0xff] %vm305_vm1, %v1882_v59 }
 0x156   : > { %v2273_v7 = vmul.f32 %v4273_v57, %v2138_v1  ;;  %v2207_v9 = vmul.f32 %v4273_v57, %v2072_v2  ;;  %v2136_v10 = vld [vmem:[%s3198_s5 + $0x380] sm:$0xff]  ;;  %v2075_v11 = vld [vmem:[%s3198_s5 + $0x198] sm:$0xff]  ;;  %1945 = vst.msk [vmem:[%s3198_s5 + $0x1a0] sm:$0xff] %vm305_vm1, %v1816_v60  ;;  %2009 = vst.msk [vmem:[%s3198_s5 + $0x3a0] sm:$0xff] %vm305_vm1, %v1880_v3  ;;  %v2947_v35 = vpop.f32.mrb[56].mxu0 }
 0x157   : > { %v2344_v15 = vadd.f32 %v4291_v8, %v2209_v0  ;;  %v2271_v16 = vmul.f32 %v4273_v57, %v2136_v10  ;;  %v2210_v17 = vmul.f32 %v4273_v57, %v2075_v11  ;;  %v2139_v18 = vld [vmem:[%s3198_s5 + $0x398] sm:$0xff]  ;;  %v2073_v19 = vld [vmem:[%s3198_s5 + $0x188] sm:$0xff]  ;;  %1948 = vst.msk [vmem:[%s3198_s5 + $0x1b8] sm:$0xff] %vm305_vm1, %v1819_v4  ;;  %2012 = vst.msk [vmem:[%s3198_s5 + $0x3b8] sm:$0xff] %vm305_vm1, %v1883_v12  ;;  %v3011_v40 = vpop.f32.mrb[56].mxu1  ;;  %v1477_v42 = vpop.f32.mrb[57].mxu0 }
 0x158   : > { %v2408_v21 = vadd.f32 %v4291_v8, %v2273_v7  ;;  %v2342_v22 = vadd.f32 %v4291_v8, %v2207_v9  ;;  %v2274_v23 = vmul.f32 %v4273_v57, %v2139_v18  ;;  %v2208_v24 = vmul.f32 %v4273_v57, %v2073_v19  ;;  %v2137_v25 = vld [vmem:[%s3198_s5 + $0x388] sm:$0xff]  ;;  %1946 = vst.msk [vmem:[%s3198_s5 + $0x1a8] sm:$0xff] %vm305_vm1, %v1817_v13  ;;  %v1733_v47 = vpop.f32.mrb[57].mxu1  ;;  %v2948_v48 = vpop.f32.mrb[58].mxu0  ;;  %v496_v12 = vld [vmem:[%s3198_s5 + $0x1f0] sm:$0xff] }
 0x159   : > { %2472 = vst.msk [vmem:[%s3198_s5 + $0x190] sm:$0xff] %vm305_vm1, %v2344_v15  ;;  %v2406_v27 = vadd.f32 %v4291_v8, %v2271_v16  ;;  %v2345_v28 = vadd.f32 %v4291_v8, %v2210_v17  ;;  %v2272_v29 = vmul.f32 %v4273_v57, %v2137_v25  ;;  %2010 = vst.msk [vmem:[%s3198_s5 + $0x3a8] sm:$0xff] %vm305_vm1, %v1881_v20  ;;  %v3012_v55 = vpop.f32.mrb[58].mxu1  ;;  %v1480_v56 = vpop.f32.mrb[59].mxu0  ;;  %v560_v16 = vld [vmem:[%s3198_s5 + $0x3f0] sm:$0xff]  ;;  %v494_v17 = vld [vmem:[%s3198_s5 + $0x1e0] sm:$0xff] }
 0x15a   : > { %2536 = vst.msk [vmem:[%s3198_s5 + $0x390] sm:$0xff] %vm305_vm1, %v2408_v21  ;;  %2470 = vst.msk [vmem:[%s3198_s5 + $0x180] sm:$0xff] %vm305_vm1, %v2342_v22  ;;  %v2409_v33 = vadd.f32 %v4291_v8, %v2274_v23  ;;  %v2343_v34 = vadd.f32 %v4291_v8, %v2208_v24  ;;  %v1822_v39 = vadd.f32 %v2947_v35, %v492_v26  ;;  %v1736_v63 = vpop.f32.mrb[59].mxu1  ;;  %v558_v21 = vld [vmem:[%s3198_s5 + $0x3e0] sm:$0xff]  ;;  %v497_v22 = vld [vmem:[%s3198_s5 + $0x1f8] sm:$0xff] }
 0x15b   : > { %2534 = vst.msk [vmem:[%s3198_s5 + $0x380] sm:$0xff] %vm305_vm1, %v2406_v27  ;;  %2473 = vst.msk [vmem:[%s3198_s5 + $0x198] sm:$0xff] %vm305_vm1, %v2345_v28  ;;  %v2407_v38 = vadd.f32 %v4291_v8, %v2272_v29  ;;  %v2078_v45 = vld [vmem:[%s3198_s5 + $0x1b0] sm:$0xff]  ;;  %v1886_v31 = vadd.f32 %v3011_v40, %v556_v30  ;;  %v1820_v46 = vadd.f32 %v1477_v42, %v490_v32  ;;  %v561_v27 = vld [vmem:[%s3198_s5 + $0x3f8] sm:$0xff] }
 0x15c   : > { %2537 = vst.msk [vmem:[%s3198_s5 + $0x398] sm:$0xff] %vm305_vm1, %v2409_v33  ;;  %2471 = vst.msk [vmem:[%s3198_s5 + $0x188] sm:$0xff] %vm305_vm1, %v2343_v34  ;;  %v2213_v50 = vmul.f32 %v4273_v57, %v2078_v45  ;;  %v2142_v51 = vld [vmem:[%s3198_s5 + $0x3b0] sm:$0xff]  ;;  %v1884_v53 = vadd.f32 %v1733_v47, %v554_v36  ;;  %v1823_v54 = vadd.f32 %v2948_v48, %v493_v37  ;;  %v495_v28 = vld [vmem:[%s3198_s5 + $0x1e8] sm:$0xff] }
 0x15d   : > { %2535 = vst.msk [vmem:[%s3198_s5 + $0x388] sm:$0xff] %vm305_vm1, %v2407_v38  ;;  %v2076_v52 = vld [vmem:[%s3198_s5 + $0x1a0] sm:$0xff]  ;;  %1951 = vst.msk [vmem:[%s3198_s5 + $0x1d0] sm:$0xff] %vm305_vm1, %v1822_v39  ;;  %v2277_v41 = vmul.f32 %v4273_v57, %v2142_v51  ;;  %v1887_v61 = vadd.f32 %v3012_v55, %v557_v43  ;;  %v1821_v62 = vadd.f32 %v1480_v56, %v491_v44  ;;  %v559_v35 = vld [vmem:[%s3198_s5 + $0x3e8] sm:$0xff] }
 0x15e   : > { %v2211_v58 = vmul.f32 %v4273_v57, %v2076_v52  ;;  %v2140_v59 = vld [vmem:[%s3198_s5 + $0x3a0] sm:$0xff]  ;;  %v2079_v60 = vld [vmem:[%s3198_s5 + $0x1b8] sm:$0xff]  ;;  %2015 = vst.msk [vmem:[%s3198_s5 + $0x3d0] sm:$0xff] %vm305_vm1, %v1886_v31  ;;  %1949 = vst.msk [vmem:[%s3198_s5 + $0x1c0] sm:$0xff] %vm305_vm1, %v1820_v46  ;;  %v2348_v0 = vadd.f32 %v4291_v8, %v2213_v50  ;;  %v1885_v5 = vadd.f32 %v1736_v63, %v555_v49  ;;  %v2951_v20 = vpop.f32.mrb[60].mxu0 }
 0x15f   : > { %v2275_v1 = vmul.f32 %v4273_v57, %v2140_v59  ;;  %v2214_v2 = vmul.f32 %v4273_v57, %v2079_v60  ;;  %v2143_v3 = vld [vmem:[%s3198_s5 + $0x3b8] sm:$0xff]  ;;  %v2077_v4 = vld [vmem:[%s3198_s5 + $0x1a8] sm:$0xff]  ;;  %2013 = vst.msk [vmem:[%s3198_s5 + $0x3c0] sm:$0xff] %vm305_vm1, %v1884_v53  ;;  %1952 = vst.msk [vmem:[%s3198_s5 + $0x1d8] sm:$0xff] %vm305_vm1, %v1823_v54  ;;  %v2412_v6 = vadd.f32 %v4291_v8, %v2277_v41  ;;  %v3015_v25 = vpop.f32.mrb[60].mxu1  ;;  %v1493_v26 = vpop.f32.mrb[61].mxu0 }
 0x160   : > { %v2346_v7 = vadd.f32 %v4291_v8, %v2211_v58  ;;  %v2278_v9 = vmul.f32 %v4273_v57, %v2143_v3  ;;  %v2212_v10 = vmul.f32 %v4273_v57, %v2077_v4  ;;  %v2141_v11 = vld [vmem:[%s3198_s5 + $0x3a8] sm:$0xff]  ;;  %2016 = vst.msk [vmem:[%s3198_s5 + $0x3d8] sm:$0xff] %vm305_vm1, %v1887_v61  ;;  %1950 = vst.msk [vmem:[%s3198_s5 + $0x1c8] sm:$0xff] %vm305_vm1, %v1821_v62  ;;  %v1749_v33 = vpop.f32.mrb[61].mxu1  ;;  %v2952_v34 = vpop.f32.mrb[62].mxu0 }
 0x161   : > { %2476 = vst.msk [vmem:[%s3198_s5 + $0x1b0] sm:$0xff] %vm305_vm1, %v2348_v0  ;;  %v2410_v13 = vadd.f32 %v4291_v8, %v2275_v1  ;;  %v2349_v14 = vadd.f32 %v4291_v8, %v2214_v2  ;;  %v2276_v15 = vmul.f32 %v4273_v57, %v2141_v11  ;;  %2014 = vst.msk [vmem:[%s3198_s5 + $0x3c8] sm:$0xff] %vm305_vm1, %v1885_v5  ;;  %v3016_v42 = vpop.f32.mrb[62].mxu1  ;;  %v1496_v43 = vpop.f32.mrb[63].mxu0 }
 0x162   : > { %2540 = vst.msk [vmem:[%s3198_s5 + $0x3b0] sm:$0xff] %vm305_vm1, %v2412_v6  ;;  %2474 = vst.msk [vmem:[%s3198_s5 + $0x1a0] sm:$0xff] %vm305_vm1, %v2346_v7  ;;  %v2413_v18 = vadd.f32 %v4291_v8, %v2278_v9  ;;  %v2347_v19 = vadd.f32 %v4291_v8, %v2212_v10  ;;  %v1826_v24 = vadd.f32 %v2951_v20, %v496_v12  ;;  %v1752_v49 = vpop.f32.mrb[63].mxu1 }
 0x163   : > { %2538 = vst.msk [vmem:[%s3198_s5 + $0x3a0] sm:$0xff] %vm305_vm1, %v2410_v13  ;;  %2477 = vst.msk [vmem:[%s3198_s5 + $0x1b8] sm:$0xff] %vm305_vm1, %v2349_v14  ;;  %v2411_v23 = vadd.f32 %v4291_v8, %v2276_v15  ;;  %v1890_v30 = vadd.f32 %v3015_v25, %v560_v16  ;;  %v1824_v32 = vadd.f32 %v1493_v26, %v494_v17 }
 0x164   : > { %2541 = vst.msk [vmem:[%s3198_s5 + $0x3b8] sm:$0xff] %vm305_vm1, %v2413_v18  ;;  %2475 = vst.msk [vmem:[%s3198_s5 + $0x1a8] sm:$0xff] %vm305_vm1, %v2347_v19  ;;  %v2082_v29 = vld [vmem:[%s3198_s5 + $0x1d0] sm:$0xff]  ;;  %v1888_v39 = vadd.f32 %v1749_v33, %v558_v21  ;;  %v1827_v40 = vadd.f32 %v2952_v34, %v497_v22  ;;  %v1891_v47 = vadd.f32 %v3016_v42, %v561_v27 }
 0x165   : > { %2539 = vst.msk [vmem:[%s3198_s5 + $0x3a8] sm:$0xff] %vm305_vm1, %v2411_v23  ;;  %v2217_v36 = vmul.f32 %v4273_v57, %v2082_v29  ;;  %v2146_v37 = vld [vmem:[%s3198_s5 + $0x3d0] sm:$0xff]  ;;  %v2080_v38 = vld [vmem:[%s3198_s5 + $0x1c0] sm:$0xff]  ;;  %1955 = vst.msk [vmem:[%s3198_s5 + $0x1f0] sm:$0xff] %vm305_vm1, %v1826_v24  ;;  %v1825_v48 = vadd.f32 %v1496_v43, %v495_v28  ;;  %v1889_v55 = vadd.f32 %v1752_v49, %v559_v35 }
 0x166   : > { %v2281_v44 = vmul.f32 %v4273_v57, %v2146_v37  ;;  %v2215_v45 = vmul.f32 %v4273_v57, %v2080_v38  ;;  %v2144_v31 = vld [vmem:[%s3198_s5 + $0x3c0] sm:$0xff]  ;;  %v2083_v46 = vld [vmem:[%s3198_s5 + $0x1d8] sm:$0xff]  ;;  %2019 = vst.msk [vmem:[%s3198_s5 + $0x3f0] sm:$0xff] %vm305_vm1, %v1890_v30  ;;  %1953 = vst.msk [vmem:[%s3198_s5 + $0x1e0] sm:$0xff] %vm305_vm1, %v1824_v32 }
 0x167   : > { %v2352_v50 = vadd.f32 %v4291_v8, %v2217_v36  ;;  %v2279_v51 = vmul.f32 %v4273_v57, %v2144_v31  ;;  %v2218_v52 = vmul.f32 %v4273_v57, %v2083_v46  ;;  %v2147_v53 = vld [vmem:[%s3198_s5 + $0x3d8] sm:$0xff]  ;;  %v2081_v54 = vld [vmem:[%s3198_s5 + $0x1c8] sm:$0xff]  ;;  %2017 = vst.msk [vmem:[%s3198_s5 + $0x3e0] sm:$0xff] %vm305_vm1, %v1888_v39  ;;  %1956 = vst.msk [vmem:[%s3198_s5 + $0x1f8] sm:$0xff] %vm305_vm1, %v1827_v40 }
 0x168   : > { %v2416_v56 = vadd.f32 %v4291_v8, %v2281_v44  ;;  %v2350_v41 = vadd.f32 %v4291_v8, %v2215_v45  ;;  %v2282_v58 = vmul.f32 %v4273_v57, %v2147_v53  ;;  %v2216_v59 = vmul.f32 %v4273_v57, %v2081_v54  ;;  %v2145_v60 = vld [vmem:[%s3198_s5 + $0x3c8] sm:$0xff]  ;;  %2020 = vst.msk [vmem:[%s3198_s5 + $0x3f8] sm:$0xff] %vm305_vm1, %v1891_v47 }
 0x169   : > { %1954 = vst.msk [vmem:[%s3198_s5 + $0x1e8] sm:$0xff] %vm305_vm1, %v1825_v48  ;;  %2480 = vst.msk [vmem:[%s3198_s5 + $0x1d0] sm:$0xff] %vm305_vm1, %v2352_v50  ;;  %v2414_v61 = vadd.f32 %v4291_v8, %v2279_v51  ;;  %v2353_v62 = vadd.f32 %v4291_v8, %v2218_v52  ;;  %v2280_v63 = vmul.f32 %v4273_v57, %v2145_v60 }
 0x16a   : > { %2018 = vst.msk [vmem:[%s3198_s5 + $0x3e8] sm:$0xff] %vm305_vm1, %v1889_v55  ;;  %2544 = vst.msk [vmem:[%s3198_s5 + $0x3d0] sm:$0xff] %vm305_vm1, %v2416_v56  ;;  %v2417_v0 = vadd.f32 %v4291_v8, %v2282_v58  ;;  %v2351_v1 = vadd.f32 %v4291_v8, %v2216_v59 }
 0x16b   : > { %2478 = vst.msk [vmem:[%s3198_s5 + $0x1c0] sm:$0xff] %vm305_vm1, %v2350_v41  ;;  %2542 = vst.msk [vmem:[%s3198_s5 + $0x3c0] sm:$0xff] %vm305_vm1, %v2414_v61  ;;  %v2415_v2 = vadd.f32 %v4291_v8, %v2280_v63 }
 0x16c   : > { %2481 = vst.msk [vmem:[%s3198_s5 + $0x1d8] sm:$0xff] %vm305_vm1, %v2353_v62  ;;  %2545 = vst.msk [vmem:[%s3198_s5 + $0x3d8] sm:$0xff] %vm305_vm1, %v2417_v0  ;;  %v2086_v3 = vld [vmem:[%s3198_s5 + $0x1f0] sm:$0xff] }
 0x16d   : > { %2479 = vst.msk [vmem:[%s3198_s5 + $0x1c8] sm:$0xff] %vm305_vm1, %v2351_v1  ;;  %2543 = vst.msk [vmem:[%s3198_s5 + $0x3c8] sm:$0xff] %vm305_vm1, %v2415_v2  ;;  %v2221_v4 = vmul.f32 %v4273_v57, %v2086_v3  ;;  %v2150_v5 = vld [vmem:[%s3198_s5 + $0x3f0] sm:$0xff]  ;;  %v2084_v6 = vld [vmem:[%s3198_s5 + $0x1e0] sm:$0xff] }
 0x16e   : > { %v2285_v7 = vmul.f32 %v4273_v57, %v2150_v5  ;;  %v2219_v9 = vmul.f32 %v4273_v57, %v2084_v6  ;;  %v2148_v10 = vld [vmem:[%s3198_s5 + $0x3e0] sm:$0xff]  ;;  %v2087_v11 = vld [vmem:[%s3198_s5 + $0x1f8] sm:$0xff] }
 0x16f   : > { %v2356_v12 = vadd.f32 %v4291_v8, %v2221_v4  ;;  %v2283_v13 = vmul.f32 %v4273_v57, %v2148_v10  ;;  %v2222_v14 = vmul.f32 %v4273_v57, %v2087_v11  ;;  %v2151_v15 = vld [vmem:[%s3198_s5 + $0x3f8] sm:$0xff] }
 0x170   : > { %v2085_v16 = vld [vmem:[%s3198_s5 + $0x1e8] sm:$0xff]  ;;  %v2420_v17 = vadd.f32 %v4291_v8, %v2285_v7  ;;  %v2354_v18 = vadd.f32 %v4291_v8, %v2219_v9  ;;  %v2286_v19 = vmul.f32 %v4273_v57, %v2151_v15 }
 0x171   : > { %v2220_v20 = vmul.f32 %v4273_v57, %v2085_v16  ;;  %v2149_v21 = vld [vmem:[%s3198_s5 + $0x3e8] sm:$0xff]  ;;  %2484 = vst.msk [vmem:[%s3198_s5 + $0x1f0] sm:$0xff] %vm305_vm1, %v2356_v12  ;;  %v2418_v22 = vadd.f32 %v4291_v8, %v2283_v13  ;;  %v2357_v23 = vadd.f32 %v4291_v8, %v2222_v14 }
 0x172   : > { %v2284_v24 = vmul.f32 %v4273_v57, %v2149_v21  ;;  %2548 = vst.msk [vmem:[%s3198_s5 + $0x3f0] sm:$0xff] %vm305_vm1, %v2420_v17  ;;  %2482 = vst.msk [vmem:[%s3198_s5 + $0x1e0] sm:$0xff] %vm305_vm1, %v2354_v18  ;;  %v2421_v25 = vadd.f32 %v4291_v8, %v2286_v19 }
 0x173   : > { %v2355_v26 = vadd.f32 %v4291_v8, %v2220_v20  ;;  %2546 = vst.msk [vmem:[%s3198_s5 + $0x3e0] sm:$0xff] %vm305_vm1, %v2418_v22  ;;  %2485 = vst.msk [vmem:[%s3198_s5 + $0x1f8] sm:$0xff] %vm305_vm1, %v2357_v23 }
 0x174   : > { %v2419_v27 = vadd.f32 %v4291_v8, %v2284_v24  ;;  %2549 = vst.msk [vmem:[%s3198_s5 + $0x3f8] sm:$0xff] %vm305_vm1, %v2421_v25 }
 0x175   : > { %2483 = vst.msk [vmem:[%s3198_s5 + $0x1e8] sm:$0xff] %vm305_vm1, %v2355_v26 }
 0x176   : > { %2547 = vst.msk [vmem:[%s3198_s5 + $0x3e8] sm:$0xff] %vm305_vm1, %v2419_v27 }
 0x177 PF: > { %s14_s17 = sadd.s32 1, %s3138_s17   ;;  %s4773_s15 = smov %s3134_s16 }
 0x178   : > { %p11_p5 = scmp.ge.s32.totalorder %s14_s17, 34   ;;  %s4774_s16 = smov %s4776_s18 }
 0x17a   :  { %13 = sbr.rel (!%p11_p5) target bundleno = 2 (0x2), region = 83 }

</bundles_post_ra>
